<compile_context>
chip_gen: v7x
topology: tpu7x:2x2x1
jax: 0.10.0
libtpu: 0.0.40
codegen_flags: <defaults>
</compile_context>

<pallas_src>
import functools

import jax
import jax.numpy as jnp
from jax.experimental import pallas as pl
from jax.experimental.pallas import tpu as pltpu


def _round_up(x, m):
    return (x + m - 1) // m * m


def _vmem_capacity_bytes():
    """Physical VMEM per TensorCore (falls back to 128 MiB if undiscoverable)."""
    try:
        info = pltpu.get_tpu_info()
        for attr in ("vmem_capacity_bytes", "vmem_size_bytes", "vmem_bytes"):
            v = getattr(info, attr, None)
            if v:
                return int(v)
    except Exception:
        pass
    return 128 << 20


def _pick_tile_cout(cout_p, cin_p, w_bytes, budget):
    """Largest multiple-of-128 divisor of cout_p whose double-buffered weight block fits.

    Preferring the full cout_p makes the weight BlockSpec index constant so Pallas DMAs the
    weights exactly once for the whole kernel instead of once per (batch, row-tile)."""
    t = cout_p
    while t > 128:
        if cout_p % t == 0 and 2 * 9 * cin_p * t * w_bytes <= budget // 2:
            return t
        t -= 128
    return 128


def _pick_tile_h(H, Wp, cin_p, tcout, x_bytes, out_bytes, w_bytes, budget, max_th=None):
    """Largest row-tile height (divisor of H) whose full working set fits the VMEM budget."""
    def cost(th):
        m = th * Wp
        return (2 * (th + 3) * Wp * cin_p * x_bytes   # double-buffered halo'd input tile
                + 2 * m * tcout * 4                   # f32 SSA accumulator (+ temp) headroom
                + 2 * m * tcout * out_bytes           # double-buffered output block
                + 2 * 9 * cin_p * tcout * w_bytes     # double-buffered weight block
                + 8 * tcout * 4)                      # BN scale / shift
    cands = [t for t in range(1, H + 1) if H % t == 0]
    if max_th is not None:
        capped = [t for t in cands if t <= max_th]
        if capped:
            cands = capped
    fitting = [t for t in cands if cost(t) <= budget]
    return max(fitting) if fitting else min(cands)


def _darknet_conv_kernel(x_ref, w_ref, scale_ref, shift_ref, o_ref, *, th, wp, act):
    """One (batch, row-tile, cout-tile) grid step.

    x_ref:     ((th+3)*wp, cin_p)   halo'd, flattened input row tile (compute dtype)
    w_ref:     (3, 3, cin_p, tcout) HWIO weights (compute dtype)
    scale_ref: (1, tcout)           folded-BN scale (f32)
    shift_ref: (1, tcout)           folded-BN shift (f32)
    o_ref:     (th*wp, tcout)       output tile
    """
    m = th * wp

    # 3x3 stride-1 conv as 9 statically-shifted matmuls with K = lane-padded Cin.
    # SSA accumulation (no Ref read-modify-write); operands stay in their input dtype for the
    # MXU with f32 accumulation via preferred_element_type.
    acc = None
    for kh in range(3):
        for kw in range(3):
            off = kh * wp + kw
            patch = x_ref[off:off + m, :]                     # (m, cin_p), static slice
            prod = jax.lax.dot_general(
                patch, w_ref[kh, kw, :, :],
                dimension_numbers=(((1,), (0,)), ((), ())),
                preferred_element_type=jnp.float32)
            acc = prod if acc is None else acc + prod

    # Folded BatchNorm (inference / running stats) + activation, in f32.
    y = acc * scale_ref[...] + shift_ref[...]
    if act == "mish":
        # mish(y) = y * tanh(softplus(y));  tanh(softplus(y)) = ((1+e^y)^2 - 1)/((1+e^y)^2 + 1)
        e = jnp.exp(jnp.minimum(y, 20.0))
        u = (1.0 + e) * (1.0 + e)
        tsp = (u - 1.0) * pl.reciprocal(u + 1.0, approx=True)
        out = jnp.where(y > 20.0, y, y * tsp)
    elif act == "leaky":
        out = jnp.where(y >= 0.0, y, 0.1 * y)
    else:
        out = y
    o_ref[...] = out.reshape(o_ref.shape).astype(o_ref.dtype)


def darknet_conv2d(x_nchw, w_oihw, gamma, beta, running_mean, running_var,
                   eps=1e-5, act="mish", tile_h=None, tile_cout=None,
                   compute_dtype=jnp.bfloat16):
    """Forward of DarknetConv2D (bn_act=True, stride-1 'same' path). NCHW in / NCHW out."""
    N, Cin, H, W = x_nchw.shape
    Cout = w_oihw.shape[0]
    LANE = 128

    cin_p = _round_up(Cin, LANE)
    cout_p = _round_up(Cout, LANE)
    # Wp = 1 left halo col + W cols + >=1 right halo/gutter cols, rounded to a multiple of 8 so
    # every row tile is sublane-aligned (the extra gutter columns are computed and discarded).
    Wp = _round_up(W + 2, 8)

    x_b = jnp.dtype(compute_dtype).itemsize
    w_b = x_b
    o_b = jnp.dtype(x_nchw.dtype).itemsize

    # Generation-aware VMEM sizing (v5e/v6e: 128 MiB, v7x: 64 MiB per TensorCore).
    vmem_cap = _vmem_capacity_bytes()
    budget = max(12 << 20, vmem_cap // 3)

    tcout = tile_cout if tile_cout is not None else _pick_tile_cout(cout_p, cin_p, w_b, budget)
    tcout = min(tcout, cout_p)
    assert cout_p % tcout == 0 and tcout % LANE == 0, (cout_p, tcout)

    # Keep >=2 row tiles when N == 1 so both v7x TensorCores get parallel work.
    max_th = H // 2 if (N == 1 and H > 1) else None
    th = tile_h if tile_h is not None else _pick_tile_h(
        H, Wp, cin_p, tcout, x_b, o_b, w_b, budget, max_th=max_th)
    assert H % th == 0, (H, th)

    n_h = H // th
    n_co = cout_p // tcout
    m = th * Wp
    R = (th + 3) * Wp      # halo'd rows per tile after flattening (rows, cols) -> rows*Wp

    # --- wrapper-side layout ---------------------------------------------------------------
    # NCHW -> NHWC, cast to compute dtype, pad (+1/+2 halo rows, +1 left / Wp-W-1 right halo+
    # gutter cols, Cin lane pad), then cut overlapping halo'd row tiles so a plain BlockSpec can
    # pipeline the halo DMA (double-buffered, megacore-safe) with no manual async copies.
    # TODO(synk): keeping the surrounding model NHWC end-to-end would remove these transposes.
    x = jnp.transpose(x_nchw, (0, 2, 3, 1)).astype(compute_dtype)
    x = jnp.pad(x, ((0, 0), (1, 2), (1, Wp - W - 1), (0, cin_p - Cin)))   # (N, H+3, Wp, cin_p)
    if n_h == 1:
        x_tiles = x.reshape(N, 1, R, cin_p)
    else:
        x_tiles = jnp.stack([x[:, i * th: i * th + th + 3] for i in range(n_h)],
                            axis=1).reshape(N, n_h, R, cin_p)

    # OIHW -> HWIO with lane-padded channels, compute dtype.
    w = jnp.transpose(w_oihw, (2, 3, 1, 0)).astype(compute_dtype)
    w = jnp.pad(w, ((0, 0), (0, 0), (0, cin_p - Cin), (0, cout_p - Cout)))

    # Fold BatchNorm (inference running stats) into a per-channel affine (f32).
    inv = (gamma / jnp.sqrt(running_var + eps)).astype(jnp.float32)
    scale = jnp.pad(inv, (0, cout_p - Cout)).reshape(1, cout_p)
    shift = jnp.pad((beta - running_mean * inv).astype(jnp.float32),
                    (0, cout_p - Cout)).reshape(1, cout_p)

    est = (2 * R * cin_p * x_b            # halo'd input tile, double buffered
           + 2 * m * tcout * 4            # f32 accumulator headroom
           + 2 * m * tcout * o_b          # output block, double buffered
           + 2 * 9 * cin_p * tcout * w_b  # weight block, double buffered
           + 8 * cout_p * 4)              # BN scale / shift
    vmem_limit = max(16 << 20, min(int(est * 1.5) + (2 << 20), vmem_cap * 3 // 4))

    grid = (N, n_h, n_co)
    out_tiles = pl.pallas_call(
        functools.partial(_darknet_conv_kernel, th=th, wp=Wp, act=act),
        out_shape=jax.ShapeDtypeStruct((N, n_h, m, cout_p), x_nchw.dtype),
        grid_spec=pltpu.PrefetchScalarGridSpec(
            num_scalar_prefetch=0,
            grid=grid,
            in_specs=[
                pl.BlockSpec((None, None, R, cin_p), lambda n, i, j: (n, i, 0, 0)),   # halo'd input
                pl.BlockSpec((3, 3, cin_p, tcout), lambda n, i, j: (0, 0, 0, j)),     # weights
                pl.BlockSpec((1, tcout), lambda n, i, j: (0, j)),                     # BN scale
                pl.BlockSpec((1, tcout), lambda n, i, j: (0, j)),                     # BN shift
            ],
            out_specs=pl.BlockSpec((None, None, m, tcout), lambda n, i, j: (n, i, 0, j)),
        ),
        compiler_params=pltpu.CompilerParams(
            dimension_semantics=("parallel", "parallel", "arbitrary"),
            vmem_limit_bytes=int(vmem_limit),
        ),
        cost_estimate=pl.CostEstimate(
            flops=int(2 * 9 * N * H * Wp * cin_p * cout_p),
            transcendentals=int(N * H * Wp * cout_p if act == "mish" else 0),
            bytes_accessed=int(x_tiles.size * x_b
                               + w.size * w_b * (1 if n_co == 1 else N * n_h)
                               + N * H * Wp * cout_p * o_b
                               + 2 * cout_p * 4),
        ),
    )(x_tiles, w, scale, shift)

    # Drop gutter columns and padded channels; back to PyTorch NCHW.
    out = out_tiles.reshape(N, H, Wp, cout_p)[:, :, :W, :Cout]
    return jnp.transpose(out, (0, 3, 1, 2))


if __name__ == "__main__":
    key = jax.random.PRNGKey(0)
    k_x, k_w, k_g, k_b = jax.random.split(key, 4)

    N, Cin, H, W = 2, 4, 16, 16
    Cout = 8

    x = jax.random.normal(k_x, (N, Cin, H, W), dtype=jnp.float32)
    # Conv weights (OIHW), no conv bias since bn_act=True.
    fan_in = Cin * 3 * 3
    w = jax.random.normal(k_w, (Cout, Cin, 3, 3), dtype=jnp.float32) * (2.0 / fan_in) ** 0.5
    # BatchNorm params (perturbed so the affine isn't a no-op).
    gamma = 1.0 + 0.1 * jax.random.normal(k_g, (Cout,), dtype=jnp.float32)
    beta = 0.1 * jax.random.normal(k_b, (Cout,), dtype=jnp.float32)
    running_mean = jnp.zeros((Cout,), jnp.float32)
    running_var = jnp.ones((Cout,), jnp.float32)

    # tile_h=8 -> 2 overlapping halo'd row tiles per image, exercising the tiled path.
    out = darknet_conv2d(x, w, gamma, beta, running_mean, running_var,
                         act="mish", tile_h=8)
    jax.block_until_ready(out)
    assert out.shape == (N, Cout, H, W), out.shape

    # Pure-XLA reference of the same math: conv with bf16-rounded operands / f32 accumulation
    # (matching the kernel's compute dtype), folded BN, exact mish.
    xb = x.astype(jnp.bfloat16).astype(jnp.float32)
    wb = w.astype(jnp.bfloat16).astype(jnp.float32)
    conv = jax.lax.conv_general_dilated(
        xb, wb, window_strides=(1, 1), padding="SAME",
        dimension_numbers=("NCHW", "OIHW", "NCHW"))
    inv = gamma / jnp.sqrt(running_var + 1e-5)
    y = conv * inv[None, :, None, None] + (beta - running_mean * inv)[None, :, None, None]
    ref = y * jnp.tanh(jax.nn.softplus(y))
    err = float(jnp.max(jnp.abs(out - ref)))
    assert jnp.allclose(out, ref, atol=2e-2, rtol=2e-2), err

    print("KERNEL_OK")
</pallas_src>

<mosaic_0001>
module attributes {stable_mosaic.version = 11 : i64} {
  func.func @_darknet_conv_kernel(%arg0: i32, %arg1: i32, %arg2: i32, %arg3: memref<1x1x264x128xbf16, #tpu.memory_space<vmem>>, %arg4: memref<3x3x128x128xbf16, #tpu.memory_space<vmem>>, %arg5: memref<1x128xf32, #tpu.memory_space<vmem>>, %arg6: memref<1x128xf32, #tpu.memory_space<vmem>>, %arg7: memref<1x1x192x128xf32, #tpu.memory_space<vmem>>) attributes {dimension_semantics = [#tpu.dimension_semantics<parallel>, #tpu.dimension_semantics<parallel>, #tpu.dimension_semantics<arbitrary>], iteration_bounds = array<i64: 2, 2, 1>, scalar_prefetch = 0 : i64, scratch_operands = 0 : i64, tpu.core_type = #tpu.core_type<tc>, window_params = [{transform_indices = @transform_0, window_bounds = array<i64: 1, 1, 264, 128>}, {transform_indices = @transform_1, window_bounds = array<i64: 3, 3, 128, 128>}, {transform_indices = @transform_2, window_bounds = array<i64: 1, 128>}, {transform_indices = @transform_3, window_bounds = array<i64: 1, 128>}, {transform_indices = @transform_4, window_bounds = array<i64: 1, 1, 192, 128>}]} {
    %c0 = arith.constant 0 : index
    %c0_0 = arith.constant 0 : index
    %c0_1 = arith.constant 0 : index
    %c0_2 = arith.constant 0 : index
    %0 = vector.load %arg3[%c0, %c0_0, %c0_1, %c0_2] : memref<1x1x264x128xbf16, #tpu.memory_space<vmem>>, vector<1x1x192x128xbf16>
    %1 = vector.shape_cast %0 : vector<1x1x192x128xbf16> to vector<192x128xbf16>
    %c0_3 = arith.constant 0 : index
    %c0_4 = arith.constant 0 : index
    %c0_5 = arith.constant 0 : index
    %c0_6 = arith.constant 0 : index
    %2 = vector.load %arg4[%c0_3, %c0_4, %c0_5, %c0_6] : memref<3x3x128x128xbf16, #tpu.memory_space<vmem>>, vector<1x1x128x128xbf16>
    %3 = vector.shape_cast %2 : vector<1x1x128x128xbf16> to vector<128x128xbf16>
    %cst = arith.constant dense<0.000000e+00> : vector<192x128xf32>
    %4 = tpu.matmul %1, %3, %cst {dimension_numbers = #tpu.dot_dimension_numbers<[1], [0], [0], [1], [0, 0, 1, 1], [], []>} : vector<192x128xbf16>, vector<128x128xbf16>, vector<192x128xf32> -> vector<192x128xf32>
    %c0_7 = arith.constant 0 : index
    %c0_8 = arith.constant 0 : index
    %c1 = arith.constant 1 : index
    %c0_9 = arith.constant 0 : index
    %5 = vector.load %arg3[%c0_7, %c0_8, %c1, %c0_9] : memref<1x1x264x128xbf16, #tpu.memory_space<vmem>>, vector<1x1x192x128xbf16>
    %6 = vector.shape_cast %5 : vector<1x1x192x128xbf16> to vector<192x128xbf16>
    %c0_10 = arith.constant 0 : index
    %c1_11 = arith.constant 1 : index
    %c0_12 = arith.constant 0 : index
    %c0_13 = arith.constant 0 : index
    %7 = vector.load %arg4[%c0_10, %c1_11, %c0_12, %c0_13] : memref<3x3x128x128xbf16, #tpu.memory_space<vmem>>, vector<1x1x128x128xbf16>
    %8 = vector.shape_cast %7 : vector<1x1x128x128xbf16> to vector<128x128xbf16>
    %cst_14 = arith.constant dense<0.000000e+00> : vector<192x128xf32>
    %9 = tpu.matmul %6, %8, %cst_14 {dimension_numbers = #tpu.dot_dimension_numbers<[1], [0], [0], [1], [0, 0, 1, 1], [], []>} : vector<192x128xbf16>, vector<128x128xbf16>, vector<192x128xf32> -> vector<192x128xf32>
    %10 = arith.addf %4, %9 : vector<192x128xf32>
    %c0_15 = arith.constant 0 : index
    %c0_16 = arith.constant 0 : index
    %c2 = arith.constant 2 : index
    %c0_17 = arith.constant 0 : index
    %11 = vector.load %arg3[%c0_15, %c0_16, %c2, %c0_17] : memref<1x1x264x128xbf16, #tpu.memory_space<vmem>>, vector<1x1x192x128xbf16>
    %12 = vector.shape_cast %11 : vector<1x1x192x128xbf16> to vector<192x128xbf16>
    %c0_18 = arith.constant 0 : index
    %c2_19 = arith.constant 2 : index
    %c0_20 = arith.constant 0 : index
    %c0_21 = arith.constant 0 : index
    %13 = vector.load %arg4[%c0_18, %c2_19, %c0_20, %c0_21] : memref<3x3x128x128xbf16, #tpu.memory_space<vmem>>, vector<1x1x128x128xbf16>
    %14 = vector.shape_cast %13 : vector<1x1x128x128xbf16> to vector<128x128xbf16>
    %cst_22 = arith.constant dense<0.000000e+00> : vector<192x128xf32>
    %15 = tpu.matmul %12, %14, %cst_22 {dimension_numbers = #tpu.dot_dimension_numbers<[1], [0], [0], [1], [0, 0, 1, 1], [], []>} : vector<192x128xbf16>, vector<128x128xbf16>, vector<192x128xf32> -> vector<192x128xf32>
    %16 = arith.addf %10, %15 : vector<192x128xf32>
    %c0_23 = arith.constant 0 : index
    %c0_24 = arith.constant 0 : index
    %c24 = arith.constant 24 : index
    %c0_25 = arith.constant 0 : index
    %17 = vector.load %arg3[%c0_23, %c0_24, %c24, %c0_25] : memref<1x1x264x128xbf16, #tpu.memory_space<vmem>>, vector<1x1x192x128xbf16>
    %18 = vector.shape_cast %17 : vector<1x1x192x128xbf16> to vector<192x128xbf16>
    %c1_26 = arith.constant 1 : index
    %c0_27 = arith.constant 0 : index
    %c0_28 = arith.constant 0 : index
    %c0_29 = arith.constant 0 : index
    %19 = vector.load %arg4[%c1_26, %c0_27, %c0_28, %c0_29] : memref<3x3x128x128xbf16, #tpu.memory_space<vmem>>, vector<1x1x128x128xbf16>
    %20 = vector.shape_cast %19 : vector<1x1x128x128xbf16> to vector<128x128xbf16>
    %cst_30 = arith.constant dense<0.000000e+00> : vector<192x128xf32>
    %21 = tpu.matmul %18, %20, %cst_30 {dimension_numbers = #tpu.dot_dimension_numbers<[1], [0], [0], [1], [0, 0, 1, 1], [], []>} : vector<192x128xbf16>, vector<128x128xbf16>, vector<192x128xf32> -> vector<192x128xf32>
    %22 = arith.addf %16, %21 : vector<192x128xf32>
    %c0_31 = arith.constant 0 : index
    %c0_32 = arith.constant 0 : index
    %c25 = arith.constant 25 : index
    %c0_33 = arith.constant 0 : index
    %23 = vector.load %arg3[%c0_31, %c0_32, %c25, %c0_33] : memref<1x1x264x128xbf16, #tpu.memory_space<vmem>>, vector<1x1x192x128xbf16>
    %24 = vector.shape_cast %23 : vector<1x1x192x128xbf16> to vector<192x128xbf16>
    %c1_34 = arith.constant 1 : index
    %c1_35 = arith.constant 1 : index
    %c0_36 = arith.constant 0 : index
    %c0_37 = arith.constant 0 : index
    %25 = vector.load %arg4[%c1_34, %c1_35, %c0_36, %c0_37] : memref<3x3x128x128xbf16, #tpu.memory_space<vmem>>, vector<1x1x128x128xbf16>
    %26 = vector.shape_cast %25 : vector<1x1x128x128xbf16> to vector<128x128xbf16>
    %cst_38 = arith.constant dense<0.000000e+00> : vector<192x128xf32>
    %27 = tpu.matmul %24, %26, %cst_38 {dimension_numbers = #tpu.dot_dimension_numbers<[1], [0], [0], [1], [0, 0, 1, 1], [], []>} : vector<192x128xbf16>, vector<128x128xbf16>, vector<192x128xf32> -> vector<192x128xf32>
    %28 = arith.addf %22, %27 : vector<192x128xf32>
    %c0_39 = arith.constant 0 : index
    %c0_40 = arith.constant 0 : index
    %c26 = arith.constant 26 : index
    %c0_41 = arith.constant 0 : index
    %29 = vector.load %arg3[%c0_39, %c0_40, %c26, %c0_41] : memref<1x1x264x128xbf16, #tpu.memory_space<vmem>>, vector<1x1x192x128xbf16>
    %30 = vector.shape_cast %29 : vector<1x1x192x128xbf16> to vector<192x128xbf16>
    %c1_42 = arith.constant 1 : index
    %c2_43 = arith.constant 2 : index
    %c0_44 = arith.constant 0 : index
    %c0_45 = arith.constant 0 : index
    %31 = vector.load %arg4[%c1_42, %c2_43, %c0_44, %c0_45] : memref<3x3x128x128xbf16, #tpu.memory_space<vmem>>, vector<1x1x128x128xbf16>
    %32 = vector.shape_cast %31 : vector<1x1x128x128xbf16> to vector<128x128xbf16>
    %cst_46 = arith.constant dense<0.000000e+00> : vector<192x128xf32>
    %33 = tpu.matmul %30, %32, %cst_46 {dimension_numbers = #tpu.dot_dimension_numbers<[1], [0], [0], [1], [0, 0, 1, 1], [], []>} : vector<192x128xbf16>, vector<128x128xbf16>, vector<192x128xf32> -> vector<192x128xf32>
    %34 = arith.addf %28, %33 : vector<192x128xf32>
    %c0_47 = arith.constant 0 : index
    %c0_48 = arith.constant 0 : index
    %c48 = arith.constant 48 : index
    %c0_49 = arith.constant 0 : index
    %35 = vector.load %arg3[%c0_47, %c0_48, %c48, %c0_49] : memref<1x1x264x128xbf16, #tpu.memory_space<vmem>>, vector<1x1x192x128xbf16>
    %36 = vector.shape_cast %35 : vector<1x1x192x128xbf16> to vector<192x128xbf16>
    %c2_50 = arith.constant 2 : index
    %c0_51 = arith.constant 0 : index
    %c0_52 = arith.constant 0 : index
    %c0_53 = arith.constant 0 : index
    %37 = vector.load %arg4[%c2_50, %c0_51, %c0_52, %c0_53] : memref<3x3x128x128xbf16, #tpu.memory_space<vmem>>, vector<1x1x128x128xbf16>
    %38 = vector.shape_cast %37 : vector<1x1x128x128xbf16> to vector<128x128xbf16>
    %cst_54 = arith.constant dense<0.000000e+00> : vector<192x128xf32>
    %39 = tpu.matmul %36, %38, %cst_54 {dimension_numbers = #tpu.dot_dimension_numbers<[1], [0], [0], [1], [0, 0, 1, 1], [], []>} : vector<192x128xbf16>, vector<128x128xbf16>, vector<192x128xf32> -> vector<192x128xf32>
    %40 = arith.addf %34, %39 : vector<192x128xf32>
    %c0_55 = arith.constant 0 : index
    %c0_56 = arith.constant 0 : index
    %c49 = arith.constant 49 : index
    %c0_57 = arith.constant 0 : index
    %41 = vector.load %arg3[%c0_55, %c0_56, %c49, %c0_57] : memref<1x1x264x128xbf16, #tpu.memory_space<vmem>>, vector<1x1x192x128xbf16>
    %42 = vector.shape_cast %41 : vector<1x1x192x128xbf16> to vector<192x128xbf16>
    %c2_58 = arith.constant 2 : index
    %c1_59 = arith.constant 1 : index
    %c0_60 = arith.constant 0 : index
    %c0_61 = arith.constant 0 : index
    %43 = vector.load %arg4[%c2_58, %c1_59, %c0_60, %c0_61] : memref<3x3x128x128xbf16, #tpu.memory_space<vmem>>, vector<1x1x128x128xbf16>
    %44 = vector.shape_cast %43 : vector<1x1x128x128xbf16> to vector<128x128xbf16>
    %cst_62 = arith.constant dense<0.000000e+00> : vector<192x128xf32>
    %45 = tpu.matmul %42, %44, %cst_62 {dimension_numbers = #tpu.dot_dimension_numbers<[1], [0], [0], [1], [0, 0, 1, 1], [], []>} : vector<192x128xbf16>, vector<128x128xbf16>, vector<192x128xf32> -> vector<192x128xf32>
    %46 = arith.addf %40, %45 : vector<192x128xf32>
    %c0_63 = arith.constant 0 : index
    %c0_64 = arith.constant 0 : index
    %c50 = arith.constant 50 : index
    %c0_65 = arith.constant 0 : index
    %47 = vector.load %arg3[%c0_63, %c0_64, %c50, %c0_65] : memref<1x1x264x128xbf16, #tpu.memory_space<vmem>>, vector<1x1x192x128xbf16>
    %48 = vector.shape_cast %47 : vector<1x1x192x128xbf16> to vector<192x128xbf16>
    %c2_66 = arith.constant 2 : index
    %c2_67 = arith.constant 2 : index
    %c0_68 = arith.constant 0 : index
    %c0_69 = arith.constant 0 : index
    %49 = vector.load %arg4[%c2_66, %c2_67, %c0_68, %c0_69] : memref<3x3x128x128xbf16, #tpu.memory_space<vmem>>, vector<1x1x128x128xbf16>
    %50 = vector.shape_cast %49 : vector<1x1x128x128xbf16> to vector<128x128xbf16>
    %cst_70 = arith.constant dense<0.000000e+00> : vector<192x128xf32>
    %51 = tpu.matmul %48, %50, %cst_70 {dimension_numbers = #tpu.dot_dimension_numbers<[1], [0], [0], [1], [0, 0, 1, 1], [], []>} : vector<192x128xbf16>, vector<128x128xbf16>, vector<192x128xf32> -> vector<192x128xf32>
    %52 = arith.addf %46, %51 : vector<192x128xf32>
    %c0_71 = arith.constant 0 : index
    %c0_72 = arith.constant 0 : index
    %53 = vector.load %arg5[%c0_71, %c0_72] : memref<1x128xf32, #tpu.memory_space<vmem>>, vector<1x128xf32>
    %54 = vector.broadcast %53 : vector<1x128xf32> to vector<192x128xf32>
    %55 = arith.mulf %52, %54 : vector<192x128xf32>
    %c0_73 = arith.constant 0 : index
    %c0_74 = arith.constant 0 : index
    %56 = vector.load %arg6[%c0_73, %c0_74] : memref<1x128xf32, #tpu.memory_space<vmem>>, vector<1x128xf32>
    %57 = vector.broadcast %56 : vector<1x128xf32> to vector<192x128xf32>
    %58 = arith.addf %55, %57 : vector<192x128xf32>
    %cst_75 = arith.constant 2.000000e+01 : f32
    %59 = vector.broadcast %cst_75 : f32 to vector<192x128xf32>
    %60 = arith.minimumf %58, %59 : vector<192x128xf32>
    %61 = math.exp %60 : vector<192x128xf32>
    %cst_76 = arith.constant 1.000000e+00 : f32
    %62 = vector.broadcast %cst_76 : f32 to vector<192x128xf32>
    %63 = arith.addf %62, %61 : vector<192x128xf32>
    %cst_77 = arith.constant 1.000000e+00 : f32
    %64 = vector.broadcast %cst_77 : f32 to vector<192x128xf32>
    %65 = arith.addf %64, %61 : vector<192x128xf32>
    %66 = arith.mulf %63, %65 : vector<192x128xf32>
    %cst_78 = arith.constant 1.000000e+00 : f32
    %67 = vector.broadcast %cst_78 : f32 to vector<192x128xf32>
    %68 = arith.subf %66, %67 : vector<192x128xf32>
    %cst_79 = arith.constant 1.000000e+00 : f32
    %69 = vector.broadcast %cst_79 : f32 to vector<192x128xf32>
    %70 = arith.addf %66, %69 : vector<192x128xf32>
    %71 = tpu.reciprocal %70 {approx = true} : vector<192x128xf32> -> vector<192x128xf32>
    %72 = arith.mulf %68, %71 : vector<192x128xf32>
    %cst_80 = arith.constant 2.000000e+01 : f32
    %73 = vector.broadcast %cst_80 : f32 to vector<192x128xf32>
    %74 = arith.cmpf ogt, %58, %73 : vector<192x128xf32>
    %75 = arith.mulf %58, %72 : vector<192x128xf32>
    %76 = arith.select %74, %58, %75 : vector<192x128xi1>, vector<192x128xf32>
    %c0_81 = arith.constant 0 : index
    %c0_82 = arith.constant 0 : index
    %c0_83 = arith.constant 0 : index
    %c0_84 = arith.constant 0 : index
    %77 = vector.load %arg7[%c0_81, %c0_82, %c0_83, %c0_84] : memref<1x1x192x128xf32, #tpu.memory_space<vmem>>, vector<1x1x192x128xf32>
    %78 = vector.shape_cast %77 : vector<1x1x192x128xf32> to vector<192x128xf32>
    %79 = vector.shape_cast %76 : vector<192x128xf32> to vector<1x1x192x128xf32>
    tpu.vector_store %arg7[%c0_81, %c0_82, %c0_83, %c0_84], %79 {strides = array<i32>} : memref<1x1x192x128xf32, #tpu.memory_space<vmem>>, vector<1x1x192x128xf32>,
    return
  }
  func.func @transform_0(%arg0: i32, %arg1: i32, %arg2: i32) -> (i32, i32, i32, i32) {
    %c0_i32 = arith.constant 0 : i32
    %c0_i32_0 = arith.constant 0 : i32
    %c0_i32_1 = arith.constant 0 : i32
    return %arg0, %arg1, %c0_i32, %c0_i32_0 : i32, i32, i32, i32
  }
  func.func @transform_1(%arg0: i32, %arg1: i32, %arg2: i32) -> (i32, i32, i32, i32) {
    %c0_i32 = arith.constant 0 : i32
    %c0_i32_0 = arith.constant 0 : i32
    %c0_i32_1 = arith.constant 0 : i32
    %c0_i32_2 = arith.constant 0 : i32
    return %c0_i32, %c0_i32_0, %c0_i32_1, %arg2 : i32, i32, i32, i32
  }
  func.func @transform_2(%arg0: i32, %arg1: i32, %arg2: i32) -> (i32, i32) {
    %c0_i32 = arith.constant 0 : i32
    %c0_i32_0 = arith.constant 0 : i32
    return %c0_i32, %arg2 : i32, i32
  }
  func.func @transform_3(%arg0: i32, %arg1: i32, %arg2: i32) -> (i32, i32) {
    %c0_i32 = arith.constant 0 : i32
    %c0_i32_0 = arith.constant 0 : i32
    return %c0_i32, %arg2 : i32, i32
  }
  func.func @transform_4(%arg0: i32, %arg1: i32, %arg2: i32) -> (i32, i32, i32, i32) {
    %c0_i32 = arith.constant 0 : i32
    %c0_i32_0 = arith.constant 0 : i32
    return %arg0, %arg1, %c0_i32, %arg2 : i32, i32, i32, i32
  }
}

</mosaic_0001>

<bundles_post_ra>
// kernel: tpu_custom_call.1
= control target key start
LH: loop header
LB: loop body
LE: loop exit
PB: predicated region body
PF: predicated region fallthrough
CT: control target
= control target key end

     0   :  { %s6078_s0 = inlined_call_operand.hbm [shape: bf16[2,2,264,128], index: 0, kind: input, shape index: {}]   ;;  %s6079_s1 = inlined_call_operand.hbm [shape: bf16[3,3,128,128], index: 1, kind: input, shape index: {}]   ;;  %s6080_s2 = inlined_call_operand.vmem [shape: f32[1,128], index: 2, kind: input, shape index: {}]   ;;  %s6081_s3 = inlined_call_operand.vmem [shape: f32[1,128], index: 3, kind: input, shape index: {}]   ;;  %s6082_s4 = inlined_call_operand.hbm [shape: f32[2,2,192,128], index: 4, kind: output, shape index: {}]  }
   0x1   :  { %6093 = sst [smem:[#allocation15_spill]] %s6079_s1 }
   0x2   :  { %9 = vsyncpa [#allocation3], 0 }
   0x3   :  { %11 = vsyncpa [#allocation3 + $0x1], 0 }
   0x4   :  { %12 = vsyncpa [#allocation6], 0 }
   0x5   :  { %13 = vsyncpa [#allocation4], 0 }
   0x6   :  { %15 = vsyncpa [#allocation4 + $0x1], 0  ;;  %s5110_s15 = smov 0   ;;  %s5112_s16 = smov 0  }
   0x7   :  { %s5114_s17 = smov 0   ;;  %s5116_s18 = smov 0  }
   0x8   :  { %s5118_s19 = smov 0   ;;  %s5120_s20 = smov 0  }
   0x9   :  { %s5122_s21 = smov 0   ;;  %s5124_s22 = smov 0  }
   0xa LB: > { %6094 = sst [smem:[#allocation11_spill]] %s5068_s20  ;;  %s3657_s23 = sadd.s32 4294967295, %s5076_s22   ;;  %s5076_s22 = sphi %s5124_s22, %s21_s22   ;;  %s5072_s21 = sphi %s5122_s21, %s6122_s21   ;;  %s5068_s20 = sphi %s5120_s20, %s6116_s20   ;;  %s5064_s19 = sphi %s5118_s19, %s6121_s19   ;;  %s5060_s18 = sphi %s5116_s18, %s6115_s18   ;;  %s5056_s17 = sphi %s5114_s17, %s6120_s17   ;;  %s5052_s16 = sphi %s5112_s16, %s6119_s16   ;;  %s5048_s15 = sphi %s5110_s15, %s6118_s15  }
   0xb   : > { %s3658_s24 = sadd.s32 4294967294, %s5076_s22   ;;  %p62_p0 = scmp.ne.s32.totalorder %s5052_s16, %s5048_s15 }
   0xc   : > { %p5154_p1 = scmp.eq.s32.totalorder %s3657_s23, 0  ;;  %p5158_p2 = scmp.eq.s32.totalorder %s3657_s23, 3 }
   0xd   : > { %p174_p3 = scmp.eq.s32.totalorder %s3658_s24, 3  ;;  %p3659_p5 = scmp.ge.s32.totalorder %s5076_s22, 1 }
   0xe   : > { %s6095_s25 = scalar_select %p5154_p1, 1, 0 }
   0xf   : > { %s6096_s26 = scalar_select %p5158_p2, 1, 0 }
  0x10   : > { %p5164_p4 = por %p5154_p1, %p62_p0  ;;  %p5169_p6 = por %p174_p3, %p62_p0 }
  0x11   : > { %p181_p7 = scmp.lt.s32.totalorder %s5076_s22, 5  ;;  %s5078_s30 = smov [#allocation5]  }
  0x12   : > { %s6097_s27 = scalar_select %p5164_p4, 1, 0 }
  0x13   : > { %s6098_s28 = scalar_select %p5169_p6, 1, 0 }
  0x14   : > { %p5174_p8 = pnand %p3659_p5, %p181_p7  ;;  %s195_s5 = sshll.u32 %s5078_s30, 4  ;;  %s196_s5 = int_to_ptr.vmem [resolvable:$true] %s195_s5 }
  0x15   : > { %6099 = sst [smem:[#allocation12_spill]] %s6098_s28  ;;  %s6102_s1 = sld [smem:[#allocation15_spill]] }
  0x16   : > { %s6100_s29 = scalar_select %p5174_p8, 1, 0 }
  0x17   : > { %p4597_p9 = pneg %p5174_p8 }
  0x19   : > { %p5182_p10 = pnand %p4597_p9, %p5154_p1 }
  0x1b   : > { %s4916_s9 = scalar_lea.hbm %s6102_s1, 9216  ;;  %p4918_p12 = pneg %p5182_p10 }
  0x1c   : > { %p4917_p11 = scmp.ne.s32.totalorder %s6102_s1, %s4916_s9  ;;  %p4923_p3 = scmp.lt.u32.totalorder %s4916_s9, %s6102_s1 }
  0x1e   : > { %p4919_p13 = pnand %p4918_p12, %p4917_p11 }
  0x20   : > { %p4920_p0 = pneg %p4919_p13 }
  0x22   : > { %p4925_p5 = pnand %p4923_p3, %p4920_p0 }
  0x24   : > { %4928 = shalt.err (!%p4925_p5)
}
  0x25   : > { %s4929_s14 = scalar_lea.vmem %s196_s5, 9216  ;;  %p4937_p1 = scmp.lt.s32.totalorder %s196_s5, %s196_s5 }
  0x26   : > { %p4930_p7 = scmp.ne.s32.totalorder %s196_s5, %s4929_s14  ;;  %p4938_p4 = scmp.lt.s32.totalorder %s4929_s14, %s4929_s14 }
  0x28   : > { %p4932_p9 = pnand %p4930_p7, %p4918_p12  ;;  %p4939_p8 = por %p4938_p4, %p4937_p1 }
  0x2a   : > { %p4933_p6 = pneg %p4932_p9 }
  0x2c   : > { %p4940_p2 = pnand %p4939_p8, %p4933_p6 }
  0x2e   : > { %4943 = shalt.err (!%p4940_p2)
}
  0x2f   : > { %s6087_s23 = smov 64   ;;  %s6088_s24 = smov 4  }
  0x30   : > { %4600 = dma.hbm_to_vmem [thread:$0]  (!%p5182_p10), %s6102_s1, 9216, %s196_s5, [#allocation6], %s6087_s23, %s6087_s23, %s6088_s24  }
  0x31   : > { %s36_s8 = sadd.s32 1, %s5068_s20  ;;  %s40_s9 = sadd.s32 1, %s5072_s21 }
  0x32   : > { %p38_p1 = scmp.ge.s32.totalorder %s36_s8, 2  ;;  %s49_s10 = sadd.s32 1, %s5056_s17 }
  0x33   : > { %p56_p2 = scmp.ne.s32.totalorder %s5056_s17, %s5052_s16  ;;  %p57_p4 = scmp.eq.s32.totalorder %s5076_s22, 0 }
  0x34   : > { %s6124_s8 = smov (%p38_p1, %s36_s8), 0  ;;  %s6126_s9 = smov (!%p38_p1, %s40_s9), %s5072_s21 }
  0x35   : > { %6103 = sst [smem:[#allocation13_spill]] %s6124_s8  ;;  %s45_s6 = ssub.s32 %s5068_s20, %s6124_s8 }
  0x36   : > { %p42_p6 = scmp.ge.s32.totalorder %s6126_s9, 2  ;;  %p6104_p8 = scmp.ne.s32.totalorder %s6096_s26, 0 }
  0x37   : > { %p58_p10 = por %p57_p4, %p56_p2  ;;  %p4610_p12 = scmp.lt.s32.totalorder %s5076_s22, 4 }
  0x38   : > { %p5218_p11 = por %p6104_p8, %p56_p2  ;;  %s6128_s9 = smov (%p42_p6, %s6126_s9), 0 }
  0x39   : > { %6106 = sst [smem:[#allocation14_spill]] %s6128_s9  ;;  %s221_s5 = sand.u32 1, %s5056_s17  }
  0x3a   : > { %s4583_s12 = smul.u32 33, %s5068_s20  ;;  %s44_s13 = ssub.s32 %s5072_s21, %s6128_s9 }
  0x3b   : > { %s46_s14 = sor.u32 %s45_s6, %s44_s13  ;;  %s4582_s30 = smul.u32 132, %s221_s5 }
  0x3c   : > { %p47_p13 = scmp.eq.s32.totalorder %s46_s14, 0  ;;  %s4584_s7 = smul.u32 66, %s5072_s21 }
  0x3d   : > { %p5230_p0 = pnand %p4610_p12, %p58_p10  ;;  %s225_s1 = scalar_lea.vmem [#allocation2], %s4582_s30 }
  0x3e   : > { %s5235_s26 = scalar_select %p47_p13, %s5056_s17, %s49_s10  }
  0x3f   : > { %s231_s24 = sadd.s32 %s4584_s7, %s4583_s12  ;;  %s234_s8 = sshll.u32 %s225_s1, 4  ;;  %s5237_s8 = int_to_ptr.vmem [resolvable:$true] %s234_s8 }
  0x40   : > { %s3664_s28 = sshll.u32 %s231_s24, 6  ;;  %s5244_s13 = scalar_lea.sflag [#allocation3], %s221_s5 }
  0x41   : > { %s5242_s6 = scalar_lea.hbm %s6078_s0, %s3664_s28  ;;  %p4946_p5 = pneg %p5230_p0 }
  0x42   : > { %s4944_s14 = scalar_lea.hbm %s5242_s6, 2112  ;;  %s4949_s20 = scalar_lea.hbm %s6078_s0, 8448 }
  0x43   : > { %p4945_p3 = scmp.ne.s32.totalorder %s5242_s6, %s4944_s14  ;;  %p4950_p1 = scmp.lt.u32.totalorder %s5242_s6, %s6078_s0 }
  0x44   : > { %p4951_p2 = scmp.lt.u32.totalorder %s4949_s20, %s4944_s14  ;;  %p4953_p6 = scmp.lt.u32.totalorder %s4944_s14, %s5242_s6 }
  0x45   : > { %p4947_p7 = pnand %p4946_p5, %p4945_p3 }
  0x46   : > { %p4952_p4 = por %p4951_p2, %p4950_p1 }
  0x47   : > { %p4948_p9 = pneg %p4947_p7 }
  0x48   : > { %p4954_p8 = por %p4953_p6, %p4952_p4 }
  0x4a   : > { %p4955_p10 = pnand %p4954_p8, %p4948_p9 }
  0x4c   : > { %4958 = shalt.err (!%p4955_p10)
}
  0x4d   : > { %s4959_s10 = scalar_lea.vmem %s5237_s8, 2112  ;;  %s5081_s5 = smov [#allocation2]  }
  0x4e   : > { %p4960_p12 = scmp.ne.s32.totalorder %s5237_s8, %s4959_s10  ;;  %s4964_s12 = sshll.u32 %s5081_s5, 4  ;;  %s4965_s12 = int_to_ptr.vmem [resolvable:$false] %s4964_s12 }
  0x4f   : > { %s4966_s30 = scalar_lea.vmem %s4965_s12, 4224  ;;  %p4967_p7 = scmp.lt.s32.totalorder %s5237_s8, %s4965_s12 }
  0x50   : > { %p4962_p13 = pnand %p4960_p12, %p4946_p5  ;;  %p4968_p1 = scmp.lt.s32.totalorder %s4966_s30, %s4959_s10 }
  0x52   : > { %p4963_p3 = pneg %p4962_p13  ;;  %p4969_p2 = por %p4968_p1, %p4967_p7 }
  0x54   : > { %p4970_p4 = pnand %p4969_p2, %p4963_p3 }
  0x56   : > { %4973 = shalt.err (!%p4970_p4)
}
  0x57   : > { %s6108_s7 = smov 4   ;;  %s6109_s14 = smov 64  }
  0x58   : > { %4604 = dma.hbm_to_vmem [thread:$0]  (!%p5230_p0), %s5242_s6, 2112, %s5237_s8, %s5244_s13, %s6109_s14, %s6109_s14, %s6108_s7  }
  0x59   : > { %p6110_p5 = scmp.ne.s32.totalorder %s6100_s29, 0 }
  0x5a   : > { %s5278_s1 = sand.u32 (!%p6110_p5), 1, %s5052_s16   ;;  %p6111_p9 = scmp.ne.s32.totalorder (!%p6110_p5), %s6097_s27, 0 }
  0x5b   : > { %246 = sbr.rel (%p6110_p5) target bundleno = 665 (0x299), region = 36  ;;  %s249_s20 = scalar_lea.sflag (!%p6110_p5), [#allocation3], %s5278_s1 }
  0x5c   : > { %s4585_s24 = smul.u32 (!%p6110_p5), 132, %s5278_s1 }
  0x5e   : > { %s5282_s28 = scalar_lea.vmem (!%p6110_p5), [#allocation2], %s4585_s24 }
  0x62   : > { %5035 = dma.done.wait (%p6111_p9), %s249_s20, 2112  }
  0x63   : > { %5037 = vsyncadd (%p6111_p9), %s249_s20, 4294965184  ;;  %p6112_p0 = scmp.ne.s32.totalorder %s6095_s25, 0 }
  0x65   : > { %5039 = dma.done.wait (%p6112_p0), [#allocation6], 9216  }
  0x66   : > { %5041 = vsyncadd (%p6112_p0), [#allocation6], 4294958080  ;;  %v4682_v0 = vld [vmem:[#allocation5 + $0x40] sm:$0xff]   ;;  %v4684_v2 = vld [vmem:[#allocation5 + $0x48] sm:$0xff]   ;;  %vm415_vm0 = vsmask.f32 7424 }
  0x67   : > { %v4683_v1 = vld [vmem:[#allocation5 + $0x100] sm:$0xff]   ;;  %4014 = vmatprep.subr.bf16.mxu1 %v4682_v0  ;;  %v4685_v3 = vld [vmem:[#allocation5 + $0x108] sm:$0xff]   ;;  %v4686_v4 = vld [vmem:[#allocation5 + $0x50] sm:$0xff]   ;;  %vm915_vm1 = vcmask 1046528   ;;  %s4586_s8 = smul.u32 192, %s5278_s1  ;;  %s3511_s7 = scalar_lea.sflag [#allocation4], %s5278_s1 }
  0x68   : > { %4174 = vmatprep.subr.bf16.mxu0 %v4683_v1  ;;  %4015 = vmatpush3.bf16.msra.mxu1 %v4682_v0  ;;  %v4687_v5 = vld [vmem:[#allocation5 + $0x110] sm:$0xff]   ;;  %v4688_v6 = vld [vmem:[#allocation5 + $0x58] sm:$0xff]   ;;  %v4690_v8 = vld [vmem:[#allocation5 + $0x60] sm:$0xff]   ;;  %s4587_s13 = smul.u32 24, %s5060_s18  ;;  %s5082_s24 = smov [#allocation7]  }
  0x69   : > { %4175 = vmatpush3.bf16.msra.mxu0 %v4683_v1  ;;  %4016 = vmatprep.subr.bf16.mxu1 %v4684_v2  ;;  %v4689_v7 = vld [vmem:[#allocation5 + $0x118] sm:$0xff]   ;;  %v4691_v9 = vld [vmem:[#allocation5 + $0x120] sm:$0xff]   ;;  %v4692_v10 = vld [vmem:[#allocation5 + $0x68] sm:$0xff]   ;;  %s5856_s6 = scalar_lea.vmem [#allocation7], %s4586_s8  ;;  %s4588_s9 = smul.u32 48, %s5064_s19 }
  0x6a   : > { %4176 = vmatprep.subr.bf16.mxu0 %v4685_v3  ;;  %v4693_v11 = vld [vmem:[#allocation5 + $0x128] sm:$0xff]   ;;  %v294_v12 = vld [vmem:[%s5282_s28] sm:$0xf]  ;;  %v5294_v13 = vld [vmem:[%s5282_s28 + $0x4] sm:$0xf]  ;;  %s3527_s19 = sshll.u32 %s5856_s6, 4  ;;  %s6021_s19 = int_to_ptr.vmem [resolvable:$true] %s3527_s19 }
  0x6b   : > { %v5297_v14 = vcombine.low %v294_v12, %v5294_v13  ;;  %v5300_v15 = vld [vmem:[%s5282_s28 + $0x8] sm:$0xff]   ;;  %v4694_v17 = vld [vmem:[#allocation5 + $0x70] sm:$0xff]   ;;  %v5304_v18 = vld [vmem:[%s5282_s28 + $0x10] sm:$0xf]  ;;  %s3524_s10 = sadd.s32 %s4588_s9, %s4587_s13  ;;  %s4974_s14 = scalar_lea.vmem %s6021_s19, 3072 }
  0x6c   : > { %4017 = vmatpush3.bf16.msra.mxu1 %v4684_v2  ;;  %v1468_v16 = vld [vmem:[%s5282_s28 + $0xc] sm:$0xf]  ;;  %v4695_v19 = vld [vmem:[#allocation5 + $0x130] sm:$0xff]   ;;  %v424_v22 = vshll.u32 %v5300_v15, 16  ;;  %v428_v31 = vshrl.u32 %v5300_v15, 16  ;;  %v4696_v36 = vld [vmem:[#allocation5 + $0x78] sm:$0xff]   ;;  %p4975_p6 = scmp.ne.s32.totalorder %s6021_s19, %s4974_s14 }
  0x6d   : > { %4177 = vmatpush3.bf16.msra.mxu0 %v4685_v3  ;;  %4018 = vmatprep.subr.bf16.mxu1 %v4686_v4  ;;  %v417_v20 = vshrl.u32 %v5297_v14, 16  ;;  %v419_v21 = vshll.u32 %v5297_v14, 16  ;;  %v3725_v23 = vcombine.low %v1468_v16, %v5304_v18  ;;  %v5311_v24 = vld [vmem:[%s5282_s28 + $0x14] sm:$0xff]   ;;  %v5320_v33 = vld [vmem:[%s5282_s28 + $0x1c] sm:$0xff]   ;;  %v4703_v45 = vld [vmem:[#allocation5] sm:$0xff]   ;;  %s3831_s18 = sshll.u32 %s3524_s10, 7 }
  0x6e   : > { %4178 = vmatprep.subr.bf16.mxu0 %v4687_v5  ;;  %v5314_v25 = vld [vmem:[%s5282_s28 + $0x10] sm:$0xff]   ;;  %v426_v27 = vrot.slane %v424_v22, 1  ;;  %v1581_v30 = vshll.u32 %v5311_v24, 16  ;;  %v1585_v38 = vshrl.u32 %v5311_v24, 16  ;;  %v1589_v39 = vshll.u32 %v5320_v33, 16  ;;  %v4697_v40 = vld [vmem:[#allocation5 + $0x138] sm:$0xff]   ;;  %s6019_s30 = scalar_lea.hbm %s6082_s4, %s3831_s18  ;;  %p4976_p8 = pnand %p4975_p6, %p5218_p11 }
  0x6f   : > { %v421_v26 = vrot.slane %v419_v21, 1  ;;  %v1574_v28 = vshrl.u32 %v3725_v23, 16  ;;  %v1576_v29 = vshll.u32 %v3725_v23, 16  ;;  %v432_v32 = vshll.u32 %v5314_v25, 16  ;;  %v4705_v48 = vld [vmem:[#allocation5 + $0x140] sm:$0xff]   ;;  %v5328_v49 = vld [vmem:[%s5282_s28 + $0x18] sm:$0xff]  }
  0x70   : > { %4019 = vmatpush3.bf16.msra.mxu1 %v4686_v4  ;;  %v1583_v37 = vrot.slane %v1581_v30, 1  ;;  %v430_v43 = vor.u32 %v428_v31, %v426_v27  ;;  %v436_v46 = vshrl.u32 %v5314_v25, 16  ;;  %v1593_v50 = vshrl.u32 %v5320_v33, 16  ;;  %v5332_v53 = vld [vmem:[%s5282_s28 + $0x24] sm:$0xff]   ;;  %v4706_v57 = vld [vmem:[#allocation5 + $0x8] sm:$0xff]   ;;  %p4977_p10 = pneg %p4976_p8  ;;  %s4978_s20 = sshll.u32 %s5082_s24, 4  ;;  %s4979_s20 = int_to_ptr.vmem [resolvable:$false] %s4978_s20 }
  0x71   : > { %4179 = vmatpush3.bf16.msra.mxu0 %v4687_v5  ;;  %4020 = vmatprep.subr.bf16.mxu1 %v4688_v6  ;;  %v422_v34 = vor.u32 %v421_v26, %v417_v20  ;;  %v1578_v35 = vrot.slane %v1576_v29, 1  ;;  %v434_v44 = vrot.slane %v432_v32, 1  ;;  %v1591_v52 = vrot.slane %v1589_v39, 1  ;;  %v5336_v55 = vld [vmem:[%s5282_s28 + $0x20] sm:$0xff]   ;;  %v5343_v0 = vld [vmem:[%s5282_s28 + $0x2c] sm:$0xff]   ;;  %p4981_p12 = scmp.lt.s32.totalorder %s6021_s19, %s4979_s20 }
  0x72   : > { %4180 = vmatprep.subr.bf16.mxu0 %v4689_v7  ;;  %v1587_v51 = vor.u32 %v1585_v38, %v1583_v37  ;;  %v440_v54 = vshll.u32 %v5328_v49, 16  ;;  %v1597_v59 = vshll.u32 %v5332_v53, 16  ;;  %v444_v62 = vshrl.u32 %v5328_v49, 16  ;;  %v4707_v4 = vld [vmem:[#allocation5 + $0x148] sm:$0xff]   ;;  %v5364_v29 = vld [vmem:[%s5282_s28 + $0x3c] sm:$0xff]  }
  0x73   : > { %v427_v41 = vsel %vm415_vm0, %v422_v34, %v426_v27  ;;  %v1579_v42 = vor.u32 %v1578_v35, %v1574_v28  ;;  %v435_v56 = vsel %vm415_vm0, %v430_v43, %v434_v44  ;;  %v438_v58 = vor.u32 %v436_v46, %v434_v44  ;;  %v5361_v28 = vld [vmem:[%s5282_s28 + $0x30] sm:$0xff]   ;;  %v4718_v38 = vld [vmem:[#allocation5 + $0x18] sm:$0xff]  }
  0x74   : > { %4021 = vmatpush3.bf16.msra.mxu1 %v4688_v6  ;;  %4030 = vmatprep.mubr.bf16.mxu1 %v427_v41  ;;  %v442_v60 = vrot.slane %v440_v54, 1  ;;  %v1595_v61 = vor.u32 %v1593_v50, %v1591_v52  ;;  %v448_v63 = vshll.u32 %v5336_v55, 16  ;;  %v1592_v1 = vsel %vm415_vm0, %v1587_v51, %v1591_v52  ;;  %v5374_v44 = vld [vmem:[%s5282_s28 + $0x38] sm:$0xff]   ;;  %v5384_v52 = vld [vmem:[%s5282_s28 + $0x40] sm:$0xff]  }
  0x75   : > { %4181 = vmatpush3.bf16.msra.mxu0 %v4689_v7  ;;  %4022 = vmatprep.subr.bf16.mxu1 %v4690_v8  ;;  %v1584_v47 = vsel %vm415_vm0, %v1579_v42, %v1583_v37  ;;  %v1599_v2 = vrot.slane %v1597_v59, 1  ;;  %v1601_v3 = vshrl.u32 %v5332_v53, 16  ;;  %v1605_v6 = vshll.u32 %v5343_v0, 16  ;;  %v5349_v7 = vld [vmem:[%s5282_s28 + $0x28] sm:$0xff]  }
  0x76   : > { %4182 = vmatprep.subr.bf16.mxu0 %v4691_v9  ;;  %4190 = vmatprep.mubr.bf16.mxu0 %v1584_v47  ;;  %v450_v5 = vrot.slane %v448_v63, 1  ;;  %v446_v16 = vor.u32 %v444_v62, %v442_v60  ;;  %v456_v20 = vshll.u32 %v5349_v7, 16  ;;  %v1609_v22 = vshrl.u32 %v5343_v0, 16  ;;  %v5379_v47 = vld [vmem:[%s5282_s28 + $0x44] sm:$0xff]   ;;  %v5390_v63 = vld [vmem:[%s5282_s28 + $0x4c] sm:$0xff]  }
  0x77   : > { %v1600_v12 = vsel %vm415_vm0, %v1595_v61, %v1599_v2  ;;  %v1603_v21 = vor.u32 %v1601_v3, %v1599_v2  ;;  %v460_v32 = vshrl.u32 %v5349_v7, 16  ;;  %v464_v35 = vshll.u32 %v5361_v28, 16  ;;  %v4723_v62 = vld [vmem:[#allocation5 + $0x20] sm:$0xff]  }
  0x78   : > { %4023 = vmatpush3.bf16.msra.mxu1 %v4690_v8  ;;  %v443_v8 = vsel %vm415_vm0, %v438_v58, %v442_v60  ;;  %v458_v27 = vrot.slane %v456_v20, 1  ;;  %v451_v34 = vsel %vm415_vm0, %v446_v16, %v450_v5  ;;  %v1621_v37 = vshll.u32 %v5364_v29, 16 }
  0x79   : > { %4183 = vmatpush3.bf16.msra.mxu0 %v4691_v9  ;;  %4024 = vmatprep.subr.bf16.mxu1 %v4692_v10  ;;  %v4712_v9 = vld [vmem:[#allocation5 + $0x10] sm:$0xff]   ;;  %v466_v42 = vrot.slane %v464_v35, 1  ;;  %v472_v51 = vshll.u32 %v5374_v44, 16  ;;  %v476_v58 = vshrl.u32 %v5374_v44, 16  ;;  %v480_v61 = vshll.u32 %v5384_v52, 16 }
  0x7a   : > { %4184 = vmatprep.subr.bf16.mxu0 %v4693_v11  ;;  %v1623_v43 = vrot.slane %v1621_v37, 1  ;;  %v462_v50 = vor.u32 %v460_v32, %v458_v27  ;;  %v1633_v2 = vshrl.u32 %v5379_v47, 16  ;;  %v484_v20 = vshrl.u32 %v5384_v52, 16  ;;  %v5411_v32 = vld [vmem:[%s5282_s28 + $0x5c] sm:$0xff]  }
  0x7b   : > { %v474_v59 = vrot.slane %v472_v51, 1 }
  0x7c   : > { %4025 = vmatpush3.bf16.msra.mxu1 %v4692_v10  ;;  %v452_v10 = vshrl.u32 %v5336_v55, 16  ;;  %v467_v3 = vsel %vm415_vm0, %v462_v50, %v466_v42 }
  0x7d   : > { %4185 = vmatpush3.bf16.msra.mxu0 %v4693_v11  ;;  %4026 = vmatprep.subr.bf16.mxu1 %v4694_v17  ;;  %v5354_v11 = vld [vmem:[%s5282_s28 + $0x34] sm:$0xff]  }
  0x7e   : > { %4186 = vmatprep.subr.bf16.mxu0 %v4695_v19  ;;  %v1613_v23 = vshll.u32 %v5354_v11, 16  ;;  %v454_v26 = vor.u32 %v452_v10, %v450_v5  ;;  %v1637_v5 = vshll.u32 %v5390_v63, 16 }
  0x80   : > { %4027 = vmatpush3.bf16.msra.mxu1 %v4694_v17  ;;  %v1607_v17 = vrot.slane %v1605_v6, 1  ;;  %v1615_v31 = vrot.slane %v1613_v23, 1  ;;  %v459_v41 = vsel %vm415_vm0, %v454_v26, %v458_v27  ;;  %v4725_v6 = vld [vmem:[#allocation5 + $0x160] sm:$0xff]   ;;  %v1639_v16 = vrot.slane %v1637_v5, 1 }
  0x81   : > { %4187 = vmatpush3.bf16.msra.mxu0 %v4695_v19  ;;  %4028 = vmatprep.subr.bf16.mxu1 %v4696_v36  ;;  %v4713_v19 = vld [vmem:[#allocation5 + $0x150] sm:$0xff]   ;;  %v1641_v23 = vshrl.u32 %v5390_v63, 16  ;;  %v5436_v5 = vld [vmem:[%s5282_s28 + $0x6c] ss:$0 sps:$4 sm:$0x11]  }
  0x82   : > { %4188 = vmatprep.subr.bf16.mxu0 %v4697_v40  ;;  %v1611_v30 = vor.u32 %v1609_v22, %v1607_v17  ;;  %v1608_v39 = vsel %vm415_vm0, %v1603_v21, %v1607_v17  ;;  %v4727_v17 = vld [vmem:[#allocation5 + $0x168] sm:$0xff]   ;;  %v478_v21 = vor.u32 %v476_v58, %v474_v59  ;;  %v1657_v58 = vshrl.u32 %v5411_v32, 16 }
  0x83   : > { %v5403_v22 = vld [vmem:[%s5282_s28 + $0x54] sm:$0xff]  }
  0x84   : > { %4029 = vmatpush3.bf16.msra.mxu1 %v4696_v36  ;;  %v1617_v36 = vshrl.u32 %v5354_v11, 16  ;;  %v1616_v46 = vsel %vm415_vm0, %v1611_v30, %v1615_v31  ;;  %v1645_v35 = vshll.u32 %v5403_v22, 16  ;;  %v1649_v50 = vshrl.u32 %v5403_v22, 16 }
  0x85   : > { %4189 = vmatpush3.bf16.msra.mxu0 %v4697_v40  ;;  %4054 = vmatprep.subr.bf16.mxu1 %v4703_v45  ;;  %v4719_v40 = vld [vmem:[#allocation5 + $0x158] sm:$0xff]  }
  0x86   : > { %4214 = vmatprep.subr.bf16.mxu0 %v4705_v48  ;;  %v1619_v54 = vor.u32 %v1617_v36, %v1615_v31  ;;  %v5408_v31 = vld [vmem:[%s5282_s28 + $0x50] sm:$0xff]  }
  0x87   : > { %4031 = vmatmul.mubr.bf16.vlgmr.msra.gmra.mrb[0].mxu1 %v435_v56 }
  0x88   : > { %4191 = vmatmul.mubr.bf16.vlgmr.msra.gmra.mrb[0].mxu0 %v1592_v1  ;;  %4055 = vmatpush3.bf16.msra.mxu1 %v4703_v45  ;;  %v468_v45 = vshrl.u32 %v5361_v28, 16 }
  0x89   : > { %4215 = vmatpush3.bf16.msra.mxu0 %v4705_v48  ;;  %4056 = vmatprep.subr.bf16.mxu1 %v4706_v57  ;;  %v1625_v48 = vshrl.u32 %v5364_v29, 16 }
  0x8a   : > { %4216 = vmatprep.subr.bf16.mxu0 %v4707_v4  ;;  %4034 = vmatprep.mubr.bf16.mxu1 %v443_v8  ;;  %v470_v56 = vor.u32 %v468_v45, %v466_v42  ;;  %v4726_v8 = vld [vmem:[#allocation5 + $0x28] sm:$0xff]   ;;  %v1647_v42 = vrot.slane %v1645_v35, 1 }
  0x8b   : > { %4194 = vmatprep.mubr.bf16.mxu0 %v1600_v12  ;;  %v1627_v60 = vor.u32 %v1625_v48, %v1623_v43 }
  0x8c   : > { %4057 = vmatpush3.bf16.msra.mxu1 %v4706_v57  ;;  %v1629_v57 = vshll.u32 %v5379_v47, 16  ;;  %v475_v10 = vsel %vm415_vm0, %v470_v56, %v474_v59  ;;  %v500_v56 = vshrl.u32 %v5408_v31, 16 }
  0x8d   : > { %4217 = vmatpush3.bf16.msra.mxu0 %v4707_v4  ;;  %4058 = vmatprep.subr.bf16.mxu1 %v4712_v9  ;;  %v482_v4 = vrot.slane %v480_v61, 1 }
  0x8e   : > { %4218 = vmatprep.subr.bf16.mxu0 %v4713_v19  ;;  %v1631_v1 = vrot.slane %v1629_v57, 1  ;;  %v5427_v57 = vld [vmem:[%s5282_s28 + $0x64] sm:$0xff]  }
  0x8f   : > { %4035 = vmatmul.mubr.bf16.gmra.mrb[4].mxu1 %v451_v34  ;;  %v486_v27 = vor.u32 %v484_v20, %v482_v4  ;;  %v1643_v34 = vor.u32 %v1641_v23, %v1639_v16  ;;  %v1665_v20 = vshrl.u32 %v5427_v57, 16  ;;  %v4741_v23 = vld [vmem:[#allocation5 + $0x80] sm:$0xff]  }
  0x90   : > { %4195 = vmatmul.mubr.bf16.gmra.mrb[4].mxu0 %v1608_v39  ;;  %4059 = vmatpush3.bf16.msra.mxu1 %v4712_v9  ;;  %v1624_v9 = vsel %vm415_vm0, %v1619_v54, %v1623_v43  ;;  %v1632_v12 = vsel %vm415_vm0, %v1627_v60, %v1631_v1  ;;  %v1635_v26 = vor.u32 %v1633_v2, %v1631_v1  ;;  %v1653_v39 = vshll.u32 %v5411_v32, 16  ;;  %v4733_v43 = vld [vmem:[#allocation5 + $0x170] sm:$0xff]   ;;  %v4738_v1 = vld [vmem:[#allocation5 + $0x38] sm:$0xff]  }
  0x91   : > { %4219 = vmatpush3.bf16.msra.mxu0 %v4713_v19  ;;  %4038 = vmatprep.mubr.bf16.mxu1 %v459_v41  ;;  %v5399_v19 = vld [vmem:[%s5282_s28 + $0x48] sm:$0xff]   ;;  %v483_v41 = vsel %vm415_vm0, %v478_v21, %v482_v4  ;;  %v1648_v51 = vsel %vm415_vm0, %v1643_v34, %v1647_v42  ;;  %v5423_v54 = vld [vmem:[%s5282_s28 + $0x58] sm:$0xff]   ;;  %v1651_v2 = vor.u32 %v1649_v50, %v1647_v42  ;;  %v1661_v4 = vshll.u32 %v5427_v57, 16 }
  0x92   : > { %4198 = vmatprep.mubr.bf16.mxu0 %v1616_v46  ;;  %4060 = vmatprep.subr.bf16.mxu1 %v4718_v38  ;;  %v488_v30 = vshll.u32 %v5399_v19, 16  ;;  %v492_v36 = vshrl.u32 %v5399_v19, 16  ;;  %v1640_v45 = vsel %vm415_vm0, %v1635_v26, %v1639_v16  ;;  %v1655_v60 = vrot.slane %v1653_v39, 1  ;;  %v1886_v21 = vld [vmem:[%s5282_s28 + $0xc] sm:$0xe] }
  0x93   : > { %4220 = vmatprep.subr.bf16.mxu0 %v4719_v40  ;;  %v504_v61 = vshll.u32 %v5423_v54, 16  ;;  %v4742_v34 = vld [vmem:[#allocation5 + $0x180] sm:$0xff]   ;;  %v1908_v42 = vrot.slane %v5311_v24, 1  ;;  %v919_v50 = vrot.slane %v5314_v25, 1  ;;  %v4743_v24 = vld [vmem:[#allocation5 + $0x88] sm:$0xff]  }
  0x94   : > { %4061 = vmatpush3.bf16.msra.mxu1 %v4718_v38  ;;  %v490_v37 = vrot.slane %v488_v30, 1  ;;  %v496_v38 = vshll.u32 %v5408_v31, 16  ;;  %v1656_v26 = vsel %vm415_vm0, %v1651_v2, %v1655_v60  ;;  %v1669_v30 = vshll.u32 %v5436_v5, 16 }
  0x95   : > { %4221 = vmatpush3.bf16.msra.mxu0 %v4719_v40  ;;  %4062 = vmatprep.subr.bf16.mxu1 %v4723_v62  ;;  %v4732_v40 = vld [vmem:[#allocation5 + $0x30] sm:$0xff]  }
  0x96   : > { %4222 = vmatprep.subr.bf16.mxu0 %v4725_v6  ;;  %v491_v46 = vsel %vm415_vm0, %v486_v27, %v490_v37  ;;  %v498_v48 = vrot.slane %v496_v38, 1  ;;  %v494_v59 = vor.u32 %v492_v36, %v490_v37  ;;  %v3746_v36 = vcombine.low %v1886_v21, %v5304_v18 }
  0x97   : > { %4039 = vmatmul.mubr.bf16.gmra.mrb[8].mxu1 %v467_v3  ;;  %v933_v21 = vrot.slane %v5399_v19, 1 }
  0x98   : > { %4199 = vmatmul.mubr.bf16.gmra.mrb[8].mxu0 %v1624_v9  ;;  %4042 = vmatprep.mubr.bf16.mxu1 %v475_v10  ;;  %v502_v3 = vor.u32 %v500_v56, %v498_v48  ;;  %v508_v9 = vshrl.u32 %v5423_v54, 16  ;;  %v4739_v10 = vld [vmem:[#allocation5 + $0x178] sm:$0xff]   ;;  %v1912_v56 = vrot.slane %v5332_v53, 1  ;;  %v927_v53 = vrot.slane %v5361_v28, 1 }
  0x99   : > { %4202 = vmatprep.mubr.bf16.mxu0 %v1632_v12  ;;  %4063 = vmatpush3.bf16.msra.mxu1 %v4723_v62  ;;  %v5432_v62 = vld [vmem:[%s5282_s28 + $0x60] ss:$0 sps:$4 sm:$0x11]   ;;  %v1663_v12 = vrot.slane %v1661_v4, 1 }
  0x9a   : > { %4223 = vmatpush3.bf16.msra.mxu0 %v4725_v6  ;;  %4064 = vmatprep.subr.bf16.mxu1 %v4726_v8  ;;  %v506_v6 = vrot.slane %v504_v61, 1  ;;  %v512_v16 = vshll.u32 %v5432_v62, 16 }
  0x9b   : > { %4224 = vmatprep.subr.bf16.mxu0 %v4727_v17  ;;  %v1667_v39 = vor.u32 %v1665_v20, %v1663_v12 }
  0x9c   : > { %v507_v27 = vsel %vm415_vm0, %v502_v3, %v506_v6  ;;  %v510_v37 = vor.u32 %v508_v9, %v506_v6  ;;  %v514_v38 = vrot.slane %v512_v16, 1  ;;  %v925_v3 = vrot.slane %v5349_v7, 1 }
  0x9d   : > { %4065 = vmatpush3.bf16.msra.mxu1 %v4726_v8  ;;  %v1659_v8 = vor.u32 %v1657_v58, %v1655_v60  ;;  %v1914_v6 = vrot.slane %v5343_v0, 1  ;;  %v931_v0 = vrot.slane %v5384_v52, 1 }
  0x9e   : > { %4225 = vmatpush3.bf16.msra.mxu0 %v4727_v17  ;;  %4066 = vmatprep.subr.bf16.mxu1 %v4732_v40  ;;  %v499_v17 = vsel %vm415_vm0, %v494_v59, %v498_v48  ;;  %v917_v48 = vrot.slane %v5300_v15, 1  ;;  %v923_v59 = vrot.slane %v5336_v55, 1 }
  0x9f   : > { %4043 = vmatmul.mubr.bf16.gmra.mrb[12].mxu1 %v483_v41  ;;  %4226 = vmatprep.subr.bf16.mxu0 %v4733_v43  ;;  %v1664_v35 = vsel %vm415_vm0, %v1659_v8, %v1663_v12  ;;  %v1907_v41 = vrot.slane %v3746_v36, 1  ;;  %v4746_v12 = vld [vmem:[#allocation5 + $0x190] sm:$0xff]  }
  0xa0   : > { %4203 = vmatmul.mubr.bf16.gmra.mrb[12].mxu0 %v1640_v45  ;;  %4046 = vmatprep.mubr.bf16.mxu1 %v491_v46  ;;  %v1910_v46 = vrot.slane %v5320_v33, 1  ;;  %v5459_v58 = vsel %vm915_vm1, %v917_v48, %v919_v50  ;;  %v4744_v33 = vld [vmem:[#allocation5 + $0x188] sm:$0xff]   ;;  %v5477_v9 = vsel %vm915_vm1, %v923_v59, %v925_v3 }
  0xa1   : > { %4206 = vmatprep.mubr.bf16.mxu0 %v1648_v51  ;;  %4067 = vmatpush3.bf16.msra.mxu1 %v4732_v40  ;;  %v1671_v40 = vrot.slane %v1669_v30, 1  ;;  %v1909_v18 = vsel %vm915_vm1, %v1907_v41, %v1908_v42  ;;  %v921_v51 = vrot.slane %v5328_v49, 1  ;;  %v4747_v30 = vld [vmem:[#allocation5 + $0x98] sm:$0xff]   ;;  %v4749_v41 = vld [vmem:[#allocation5 + $0xa0] sm:$0xff]  }
  0xa2   : > { %4227 = vmatpush3.bf16.msra.mxu0 %v4733_v43  ;;  %4068 = vmatprep.subr.bf16.mxu1 %v4738_v1  ;;  %v515_v43 = vsel %vm415_vm0, %v510_v37, %v514_v38  ;;  %v1911_v60 = vsel %vm915_vm1, %v1908_v42, %v1910_v46  ;;  %v1913_v4 = vsel %vm915_vm1, %v1910_v46, %v1912_v56  ;;  %v4748_v37 = vld [vmem:[#allocation5 + $0x198] sm:$0xff]   ;;  %v4754_v46 = vld [vmem:[#allocation5 + $0x1b0] sm:$0xff]  }
  0xa3   : > { %4228 = vmatprep.subr.bf16.mxu0 %v4739_v10  ;;  %v1672_v45 = vsel %vm415_vm0, %v1667_v39, %v1671_v40  ;;  %v5465_v61 = vsel %vm915_vm1, %v919_v50, %v921_v51  ;;  %v5469_v2 = vsel %vm915_vm1, %v921_v51, %v923_v59  ;;  %v1918_v40 = vrot.slane %v5364_v29, 1  ;;  %v4755_v50 = vld [vmem:[#allocation5 + $0xb8] sm:$0xff]   ;;  %v4761_v51 = vld [vmem:[#allocation5 + $0x1c0] sm:$0xff]  }
  0xa4   : > { %v1922_v29 = vrot.slane %v5390_v63, 1  ;;  %v1926_v63 = vrot.slane %v5411_v32, 1  ;;  %v4758_v32 = vld [vmem:[%s5282_s28 + $0x18] sm:$0xff]   ;;  %v4760_v59 = vld [vmem:[%s5282_s28 + $0x20] sm:$0xff]  }
  0xa5   : > { %4069 = vmatpush3.bf16.msra.mxu1 %v4738_v1 }
  0xa6   : > { %4229 = vmatpush3.bf16.msra.mxu0 %v4739_v10  ;;  %4094 = vmatprep.subr.bf16.mxu1 %v4741_v23  ;;  %v5480_v10 = vsel %vm915_vm1, %v925_v3, %v927_v53  ;;  %v4775_v3 = vld [vmem:[#allocation5 + $0x1e0] sm:$0xff]  }
  0xa7   : > { %4047 = vmatmul.mubr.bf16.gmra.mrb[16].mxu1 %v499_v17  ;;  %4254 = vmatprep.subr.bf16.mxu0 %v4742_v34  ;;  %v1916_v17 = vrot.slane %v5354_v11, 1  ;;  %v937_v11 = vrot.slane %v5423_v54, 1 }
  0xa8   : > { %4207 = vmatmul.mubr.bf16.gmra.mrb[16].mxu0 %v1656_v26  ;;  %4050 = vmatprep.mubr.bf16.mxu1 %v507_v27  ;;  %v1915_v26 = vsel %vm915_vm1, %v1912_v56, %v1914_v6  ;;  %v5499_v27 = vsel %vm915_vm1, %v931_v0, %v933_v21 }
  0xa9   : > { %4210 = vmatprep.mubr.bf16.mxu0 %v1664_v35  ;;  %v939_v35 = vrot.slane %v5432_v62, 1  ;;  %v1917_v36 = vsel %vm915_vm1, %v1914_v6, %v1916_v17  ;;  %v4750_v62 = vld [vmem:[#allocation5 + $0x1a0] sm:$0xff]   ;;  %v1919_v42 = vsel %vm915_vm1, %v1916_v17, %v1918_v40  ;;  %v4777_v6 = vld [vmem:[#allocation5 + $0x1e8] sm:$0xff]   ;;  %v4785_v17 = vld [vmem:[#allocation5 + $0x1f8] sm:$0xff]  }
  0xab   : > { %v5512_v39 = vsel %vm915_vm1, %v937_v11, %v939_v35  ;;  %v5568_v35 = vld [vmem:[%s5282_s28 + $0x28] sm:$0xff]  }
  0xaf   : > { %4051 = vmatmul.mubr.bf16.gmra.mrb[20].mxu1 %v515_v43 }
  0xb0   : > { %4211 = vmatmul.mubr.bf16.gmra.mrb[20].mxu0 %v1672_v45  ;;  %4070 = vmatprep.mubr.bf16.mxu1 %v5297_v14  ;;  %v894_v14 = vld [vmem:[%s5282_s28] sm:$0xe]  ;;  %v4751_v45 = vld [vmem:[#allocation5 + $0xa8] sm:$0xff]  }
  0xb1   : > { %4230 = vmatprep.mubr.bf16.mxu0 %v1909_v18  ;;  %v3696_v1 = vcombine.low %v894_v14, %v5294_v13  ;;  %v4745_v13 = vld [vmem:[#allocation5 + $0x90] sm:$0xff]  }
  0xb2   : > { %v4753_v18 = vld [vmem:[#allocation5 + $0xb0] sm:$0xff]  }
  0xb3   : > { %v916_v8 = vrot.slane %v3696_v1, 1  ;;  %v4765_v14 = vld [vmem:[%s5282_s28 + $0x30] sm:$0xff]   ;;  %v4770_v1 = vld [vmem:[#allocation5 + $0xd8] sm:$0xff]  }
  0xb5   : > { %v5485_v16 = vsel %vm915_vm1, %v916_v8, %v917_v48  ;;  %v4780_v8 = vld [vmem:[#allocation5 + $0xf0] sm:$0xff]  }
  0xb7   : > { %4071 = vmatmul.mubr.bf16.vlgmr.msra.gmra.mrb[0].mxu1 %v5300_v15  ;;  %v929_v15 = vrot.slane %v5374_v44, 1 }
  0xb8   : > { %4231 = vmatmul.mubr.bf16.vlgmr.msra.gmra.mrb[0].mxu0 %v1911_v60  ;;  %4095 = vmatpush3.bf16.msra.mxu1 %v4741_v23  ;;  %v4763_v60 = vld [vmem:[#allocation5 + $0x1c8] sm:$0xff]  }
  0xb9   : > { %4255 = vmatpush3.bf16.msra.mxu0 %v4742_v34  ;;  %4096 = vmatprep.subr.bf16.mxu1 %v4743_v24  ;;  %v5490_v20 = vsel %vm915_vm1, %v927_v53, %v929_v15  ;;  %v5494_v23 = vsel %vm915_vm1, %v929_v15, %v931_v0  ;;  %v4769_v53 = vld [vmem:[%s5282_s28 + $0x40] sm:$0xff]   ;;  %v5552_v15 = vld [vmem:[%s5282_s28 + $0x1c] sm:$0xf] }
  0xba   : > { %4256 = vmatprep.subr.bf16.mxu0 %v4744_v33  ;;  %4074 = vmatprep.mubr.bf16.mxu1 %v5314_v25  ;;  %v935_v25 = vrot.slane %v5408_v31, 1 }
  0xbb   : > { %4234 = vmatprep.mubr.bf16.mxu0 %v1913_v4  ;;  %v4772_v4 = vld [vmem:[%s5282_s28 + $0x48] sm:$0xff]  }
  0xbc   : > { %4097 = vmatpush3.bf16.msra.mxu1 %v4743_v24  ;;  %v5503_v34 = vsel %vm915_vm1, %v933_v21, %v935_v25  ;;  %v5509_v38 = vsel %vm915_vm1, %v935_v25, %v937_v11  ;;  %v4759_v24 = vld [vmem:[#allocation5 + $0xc0] sm:$0xff]  }
  0xbd   : > { %4257 = vmatpush3.bf16.msra.mxu0 %v4744_v33  ;;  %4098 = vmatprep.subr.bf16.mxu1 %v4745_v13  ;;  %v4768_v33 = vld [vmem:[%s5282_s28 + $0x38] sm:$0xff]   ;;  %v4791_v25 = vld [vmem:[#allocation5 + $0x200] sm:$0xff]  }
  0xbe   : > { %4258 = vmatprep.subr.bf16.mxu0 %v4746_v12  ;;  %v4782_v11 = vld [vmem:[%s5282_s28 + $0x68] sm:$0xff]  }
  0xbf   : > { %4075 = vmatmul.mubr.bf16.gmra.mrb[4].mxu1 %v5328_v49  ;;  %v1920_v49 = vrot.slane %v5379_v47, 1  ;;  %v1924_v47 = vrot.slane %v5403_v22, 1  ;;  %v1928_v22 = vrot.slane %v5427_v57, 1 }
  0xc0   : > { %4235 = vmatmul.mubr.bf16.gmra.mrb[4].mxu0 %v1915_v26  ;;  %4099 = vmatpush3.bf16.msra.mxu1 %v4745_v13  ;;  %v2459_v13 = vld [vmem:[%s5282_s28 + $0x18] sm:$0xf]  ;;  %v4779_v26 = vld [vmem:[%s5282_s28 + $0x60] sm:$0xff]  }
  0xc1   : > { %4259 = vmatpush3.bf16.msra.mxu0 %v4746_v12  ;;  %4078 = vmatprep.mubr.bf16.mxu1 %v5336_v55  ;;  %v1921_v43 = vsel %vm915_vm1, %v1918_v40, %v1920_v49  ;;  %v4752_v55 = vld [vmem:[#allocation5 + $0x1a8] sm:$0xff]   ;;  %v1923_v48 = vsel %vm915_vm1, %v1920_v49, %v1922_v29  ;;  %v1927_v56 = vsel %vm915_vm1, %v1924_v47, %v1926_v63 }
  0xc2   : > { %4238 = vmatprep.mubr.bf16.mxu0 %v1917_v36  ;;  %4100 = vmatprep.subr.bf16.mxu1 %v4747_v30  ;;  %v4774_v12 = vld [vmem:[%s5282_s28 + $0x50] sm:$0xff]   ;;  %v3775_v0 = vcombine.low %v2459_v13, %v5552_v15 }
  0xc3   : > { %4260 = vmatprep.subr.bf16.mxu0 %v4748_v37  ;;  %v4783_v40 = vld [vmem:[%s5282_s28 + $0x70] sm:$0xff]  }
  0xc4   : > { %4101 = vmatpush3.bf16.msra.mxu1 %v4747_v30  ;;  %v2567_v21 = vshll.u32 %v3775_v0, 16  ;;  %v5573_v49 = vld [vmem:[%s5282_s28 + $0x30] sm:$0xff]  }
  0xc5   : > { %4261 = vmatpush3.bf16.msra.mxu0 %v4748_v37  ;;  %4102 = vmatprep.subr.bf16.mxu1 %v4749_v41  ;;  %v4800_v13 = vld [vmem:[%s5282_s28 + $0x34] sm:$0xff]  }
  0xc6   : > { %4262 = vmatprep.subr.bf16.mxu0 %v4750_v62  ;;  %v2569_v30 = vrot.slane %v2567_v21, 1  ;;  %v4808_v21 = vld [vmem:[#allocation5 + $0x228] sm:$0xff]  }
  0xc7   : > { %4079 = vmatmul.mubr.bf16.gmra.mrb[8].mxu1 %v5349_v7  ;;  %v1925_v7 = vsel %vm915_vm1, %v1922_v29, %v1924_v47  ;;  %v5582_v29 = vld [vmem:[%s5282_s28 + $0x38] sm:$0xff]  }
  0xc8   : > { %4239 = vmatmul.mubr.bf16.gmra.mrb[8].mxu0 %v1919_v42  ;;  %4082 = vmatprep.mubr.bf16.mxu1 %v5361_v28  ;;  %v4756_v28 = vld [vmem:[#allocation5 + $0x1b8] sm:$0xff]   ;;  %v4789_v47 = vld [vmem:[%s5282_s28 + $0x14] sm:$0xff]  }
  0xc9   : > { %4242 = vmatprep.mubr.bf16.mxu0 %v1921_v43  ;;  %4103 = vmatpush3.bf16.msra.mxu1 %v4749_v41  ;;  %v4786_v41 = vld [vmem:[%s5282_s28 + $0xc] sm:$0xff]   ;;  %v2588_v43 = vshll.u32 %v5573_v49, 16 }
  0xca   : > { %4263 = vmatpush3.bf16.msra.mxu0 %v4750_v62  ;;  %4104 = vmatprep.subr.bf16.mxu1 %v4751_v45 }
  0xcb   : > { %4264 = vmatprep.subr.bf16.mxu0 %v4752_v55 }
  0xcd   : > { %4105 = vmatpush3.bf16.msra.mxu1 %v4751_v45 }
  0xce   : > { %4265 = vmatpush3.bf16.msra.mxu0 %v4752_v55  ;;  %4106 = vmatprep.subr.bf16.mxu1 %v4753_v18 }
  0xcf   : > { %4083 = vmatmul.mubr.bf16.gmra.mrb[12].mxu1 %v5374_v44  ;;  %4266 = vmatprep.subr.bf16.mxu0 %v4754_v46  ;;  %v1929_v44 = vsel %vm915_vm1, %v1926_v63, %v1928_v22  ;;  %v4793_v63 = vld [vmem:[%s5282_s28 + $0x1c] sm:$0xff]  }
  0xd0   : > { %4243 = vmatmul.mubr.bf16.gmra.mrb[12].mxu0 %v1923_v48  ;;  %4086 = vmatprep.mubr.bf16.mxu1 %v5384_v52  ;;  %v1930_v52 = vrot.slane %v5436_v5, 1  ;;  %v4766_v5 = vld [vmem:[#allocation5 + $0xd0] sm:$0xff]   ;;  %v2590_v48 = vrot.slane %v2588_v43, 1 }
  0xd1   : > { %4246 = vmatprep.mubr.bf16.mxu0 %v1925_v7  ;;  %4107 = vmatpush3.bf16.msra.mxu1 %v4753_v18  ;;  %v5586_v18 = vld [vmem:[%s5282_s28 + $0x40] sm:$0xff]   ;;  %v4792_v7 = vld [vmem:[#allocation5 + $0x208] sm:$0xff]  }
  0xd2   : > { %4267 = vmatpush3.bf16.msra.mxu0 %v4754_v46  ;;  %4108 = vmatprep.subr.bf16.mxu1 %v4755_v50  ;;  %v1931_v57 = vsel %vm915_vm1, %v1928_v22, %v1930_v52  ;;  %v2600_v22 = vshrl.u32 %v5582_v29, 16 }
  0xd3   : > { %4268 = vmatprep.subr.bf16.mxu0 %v4756_v28 }
  0xd5   : > { %4109 = vmatpush3.bf16.msra.mxu1 %v4755_v50  ;;  %v2592_v50 = vshrl.u32 %v5573_v49, 16 }
  0xd6   : > { %4269 = vmatpush3.bf16.msra.mxu0 %v4756_v28  ;;  %4134 = vmatprep.subr.bf16.mxu1 %v4759_v24  ;;  %v2596_v28 = vshll.u32 %v5582_v29, 16 }
  0xd7   : > { %4087 = vmatmul.mubr.bf16.gmra.mrb[16].mxu1 %v5399_v19  ;;  %4294 = vmatprep.subr.bf16.mxu0 %v4761_v51  ;;  %v4762_v19 = vld [vmem:[#allocation5 + $0xc8] sm:$0xff]  }
  0xd8   : > { %4247 = vmatmul.mubr.bf16.gmra.mrb[16].mxu0 %v1927_v56  ;;  %4090 = vmatprep.mubr.bf16.mxu1 %v5408_v31  ;;  %v4764_v31 = vld [vmem:[%s5282_s28 + $0x28] sm:$0xff]   ;;  %v2598_v52 = vrot.slane %v2596_v28, 1  ;;  %v4811_v28 = vld [vmem:[%s5282_s28 + $0x54] sm:$0xff]  }
  0xd9   : > { %4250 = vmatprep.mubr.bf16.mxu0 %v1929_v44  ;;  %v5596_v56 = vld [vmem:[%s5282_s28 + $0x48] sm:$0xff]   ;;  %v2594_v44 = vor.u32 %v2592_v50, %v2590_v48 }
  0xdf   : > { %4091 = vmatmul.mubr.bf16.gmra.mrb[20].mxu1 %v5423_v54  ;;  %v4767_v54 = vld [vmem:[#allocation5 + $0x1d0] sm:$0xff]  }
  0xe0   : > { %4251 = vmatmul.mubr.bf16.gmra.mrb[20].mxu0 %v1931_v57  ;;  %4110 = vmatprep.mubr.bf16.mxu1 %v5485_v16  ;;  %v4778_v16 = vld [vmem:[%s5282_s28 + $0x58] sm:$0xff]   ;;  %v5599_v57 = vld [vmem:[%s5282_s28 + $0x50] sm:$0xff]  }
  0xe1   : > { %4270 = vmatprep.mubr.bf16.mxu0 %v4758_v32  ;;  %v4797_v32 = vld [vmem:[#allocation5 + $0x210] sm:$0xff]  }
  0xe7   : > { %4111 = vmatmul.mubr.bf16.vlgmr.msra.gmra.mrb[0].mxu1 %v5459_v58  ;;  %v4771_v58 = vld [vmem:[#allocation5 + $0x1d8] sm:$0xff]  }
  0xe8   : > { %4271 = vmatmul.mubr.bf16.vlgmr.msra.gmra.mrb[0].mxu0 %v4760_v59  ;;  %4135 = vmatpush3.bf16.msra.mxu1 %v4759_v24  ;;  %v2604_v24 = vshll.u32 %v5586_v18, 16  ;;  %v4795_v59 = vld [vmem:[%s5282_s28 + $0x24] sm:$0xff]  }
  0xe9   : > { %4295 = vmatpush3.bf16.msra.mxu0 %v4761_v51  ;;  %4136 = vmatprep.subr.bf16.mxu1 %v4762_v19 }
  0xea   : > { %4296 = vmatprep.subr.bf16.mxu0 %v4763_v60  ;;  %4114 = vmatprep.mubr.bf16.mxu1 %v5465_v61  ;;  %v4773_v61 = vld [vmem:[#allocation5 + $0xe0] sm:$0xff]  }
  0xeb   : > { %4274 = vmatprep.mubr.bf16.mxu0 %v4764_v31  ;;  %v2612_v31 = vshll.u32 %v5596_v56, 16 }
  0xec   : > { %4137 = vmatpush3.bf16.msra.mxu1 %v4762_v19  ;;  %v2602_v19 = vor.u32 %v2600_v22, %v2598_v52  ;;  %v4814_v22 = vld [vmem:[%s5282_s28 + $0x5c] sm:$0xff]  }
  0xed   : > { %4297 = vmatpush3.bf16.msra.mxu0 %v4763_v60  ;;  %4138 = vmatprep.subr.bf16.mxu1 %v4766_v5  ;;  %v2606_v60 = vrot.slane %v2604_v24, 1 }
  0xee   : > { %4298 = vmatprep.subr.bf16.mxu0 %v4767_v54 }
  0xef   : > { %4115 = vmatmul.mubr.bf16.gmra.mrb[4].mxu1 %v5469_v2  ;;  %v4776_v2 = vld [vmem:[#allocation5 + $0xe8] sm:$0xff]  }
  0xf0   : > { %4275 = vmatmul.mubr.bf16.gmra.mrb[4].mxu0 %v4765_v14  ;;  %4139 = vmatpush3.bf16.msra.mxu1 %v4766_v5  ;;  %v2599_v5 = vsel %vm415_vm0, %v2594_v44, %v2598_v52  ;;  %v2608_v14 = vshrl.u32 %v5586_v18, 16 }
  0xf1   : > { %4299 = vmatpush3.bf16.msra.mxu0 %v4767_v54  ;;  %4118 = vmatprep.mubr.bf16.mxu1 %v5477_v9  ;;  %v4781_v9 = vld [vmem:[#allocation5 + $0x1f0] sm:$0xff]   ;;  %v4798_v54 = vld [vmem:[%s5282_s28 + $0x2c] sm:$0xff]  }
  0xf2   : > { %4278 = vmatprep.mubr.bf16.mxu0 %v4768_v33  ;;  %4140 = vmatprep.subr.bf16.mxu1 %v4770_v1  ;;  %v4802_v33 = vld [vmem:[#allocation5 + $0x218] sm:$0xff]  }
  0xf3   : > { %4300 = vmatprep.subr.bf16.mxu0 %v4771_v58 }
  0xf4   : > { %4141 = vmatpush3.bf16.msra.mxu1 %v4770_v1  ;;  %v2616_v1 = vshrl.u32 %v5596_v56, 16 }
  0xf5   : > { %4301 = vmatpush3.bf16.msra.mxu0 %v4771_v58  ;;  %4142 = vmatprep.subr.bf16.mxu1 %v4773_v61  ;;  %v2620_v58 = vshll.u32 %v5599_v57, 16 }
  0xf6   : > { %4302 = vmatprep.subr.bf16.mxu0 %v4775_v3 }
  0xf7   : > { %4119 = vmatmul.mubr.bf16.gmra.mrb[8].mxu1 %v5480_v10  ;;  %v4784_v10 = vld [vmem:[#allocation5 + $0xf8] sm:$0xff]  }
  0xf8   : > { %4279 = vmatmul.mubr.bf16.gmra.mrb[8].mxu0 %v4769_v53  ;;  %4122 = vmatprep.mubr.bf16.mxu1 %v5490_v20  ;;  %v5560_v20 = vld [vmem:[%s5282_s28 + $0x20] sm:$0xff]   ;;  %v5610_v53 = vld [vmem:[%s5282_s28 + $0x58] sm:$0xff]  }
  0xf9   : > { %4282 = vmatprep.mubr.bf16.mxu0 %v4772_v4  ;;  %4143 = vmatpush3.bf16.msra.mxu1 %v4773_v61  ;;  %v2576_v62 = vshrl.u32 %v5560_v20, 16  ;;  %v2607_v61 = vsel %vm415_vm0, %v2602_v19, %v2606_v60  ;;  %v2610_v4 = vor.u32 %v2608_v14, %v2606_v60  ;;  %v2909_v60 = vrot.slane %v5596_v56, 1  ;;  %v4816_v14 = vld [vmem:[%s5282_s28 + $0x64] sm:$0xff]  }
  0xfa   : > { %4303 = vmatpush3.bf16.msra.mxu0 %v4775_v3  ;;  %4144 = vmatprep.subr.bf16.mxu1 %v4776_v2  ;;  %v2614_v3 = vrot.slane %v2612_v31, 1  ;;  %v2911_v31 = vrot.slane %v5599_v57, 1  ;;  %v2901_v56 = vrot.slane %v5568_v35, 1 }
  0xfb   : > { %4304 = vmatprep.subr.bf16.mxu0 %v4777_v6 }
  0xfd   : > { %4145 = vmatpush3.bf16.msra.mxu1 %v4776_v2  ;;  %v4807_v2 = vld [vmem:[#allocation5 + $0x220] sm:$0xff]  }
  0xfe   : > { %4305 = vmatpush3.bf16.msra.mxu0 %v4777_v6  ;;  %4146 = vmatprep.subr.bf16.mxu1 %v4780_v8  ;;  %v2618_v6 = vor.u32 %v2616_v1, %v2614_v3  ;;  %v2912_v1 = vsel %vm915_vm1, %v2909_v60, %v2911_v31 }
  0xff   : > { %4123 = vmatmul.mubr.bf16.gmra.mrb[12].mxu1 %v5494_v23  ;;  %4306 = vmatprep.subr.bf16.mxu0 %v4781_v9  ;;  %v2565_v23 = vshrl.u32 %v3775_v0, 16  ;;  %v2624_v0 = vshrl.u32 %v5599_v57, 16 }
 0x100   : > { %4283 = vmatmul.mubr.bf16.gmra.mrb[12].mxu0 %v4774_v12  ;;  %4126 = vmatprep.mubr.bf16.mxu1 %v5499_v27  ;;  %v2572_v27 = vshll.u32 %v5560_v20, 16  ;;  %v4803_v12 = vld [vmem:[%s5282_s28 + $0x3c] sm:$0xff]  }
 0x101   : > { %4286 = vmatprep.mubr.bf16.mxu0 %v4778_v16  ;;  %4147 = vmatpush3.bf16.msra.mxu1 %v4780_v8  ;;  %v2570_v36 = vor.u32 %v2569_v30, %v2565_v23  ;;  %v2622_v8 = vrot.slane %v2620_v58, 1  ;;  %v2628_v16 = vshll.u32 %v5610_v53, 16  ;;  %v5624_v23 = vld [vmem:[%s5282_s28 + $0x68] sm:$0xff]   ;;  %v2913_v58 = vrot.slane %v5610_v53, 1 }
 0x102   : > { %4307 = vmatpush3.bf16.msra.mxu0 %v4781_v9  ;;  %4148 = vmatprep.subr.bf16.mxu1 %v4784_v10  ;;  %v2574_v37 = vrot.slane %v2572_v27, 1  ;;  %v5613_v9 = vld [vmem:[%s5282_s28 + $0x60] sm:$0xff]  }
 0x103   : > { %4308 = vmatprep.subr.bf16.mxu0 %v4785_v17  ;;  %v2626_v30 = vor.u32 %v2624_v0, %v2622_v8  ;;  %v2915_v57 = vrot.slane %v5613_v9, 1 }
 0x104   : > { %v2575_v42 = vsel %vm415_vm0, %v2570_v36, %v2574_v37  ;;  %v2578_v45 = vor.u32 %v2576_v62, %v2574_v37  ;;  %v4813_v37 = vld [vmem:[#allocation5 + $0x230] sm:$0xff]   ;;  %v4809_v62 = vld [vmem:[%s5282_s28 + $0x4c] sm:$0xff]  }
 0x105   : > { %4149 = vmatpush3.bf16.msra.mxu1 %v4784_v10  ;;  %v2615_v10 = vsel %vm415_vm0, %v2610_v4, %v2614_v3  ;;  %v2916_v4 = vsel %vm915_vm1, %v2913_v58, %v2915_v57 }
 0x106   : > { %4309 = vmatpush3.bf16.msra.mxu0 %v4785_v17  ;;  %4374 = vmatprep.subr.bf16.mxu1 %v4791_v25  ;;  %v2623_v17 = vsel %vm415_vm0, %v2618_v6, %v2622_v8 }
 0x107   : > { %4127 = vmatmul.mubr.bf16.gmra.mrb[16].mxu1 %v5503_v34  ;;  %4334 = vmatprep.subr.bf16.mxu0 %v4791_v25  ;;  %v2580_v34 = vshll.u32 %v5568_v35, 16 }
 0x108   : > { %4287 = vmatmul.mubr.bf16.gmra.mrb[16].mxu0 %v4779_v26  ;;  %4130 = vmatprep.mubr.bf16.mxu1 %v5509_v38  ;;  %v2584_v38 = vshrl.u32 %v5568_v35, 16  ;;  %v2636_v26 = vshll.u32 %v5613_v9, 16  ;;  %v2905_v35 = vrot.slane %v5582_v29, 1 }
 0x109   : > { %4290 = vmatprep.mubr.bf16.mxu0 %v4782_v11  ;;  %v2582_v55 = vrot.slane %v2580_v34, 1  ;;  %v2630_v11 = vrot.slane %v2628_v16, 1  ;;  %v2644_v34 = vshll.u32 %v5624_v23, 16 }
 0x10a   : > { %v2638_v36 = vrot.slane %v2636_v26, 1 }
 0x10b   : > { %v2586_v46 = vor.u32 %v2584_v38, %v2582_v55  ;;  %v2640_v38 = vshrl.u32 %v5613_v9, 16 }
 0x10d   : > { %v2591_v51 = vsel %vm415_vm0, %v2586_v46, %v2590_v48  ;;  %v2646_v46 = vrot.slane %v2644_v34, 1  ;;  %v2642_v48 = vor.u32 %v2640_v38, %v2638_v36 }
 0x10f   : > { %4131 = vmatmul.mubr.bf16.gmra.mrb[20].mxu1 %v5512_v39  ;;  %v2583_v39 = vsel %vm415_vm0, %v2578_v45, %v2582_v55  ;;  %v2648_v45 = vshrl.u32 %v5624_v23, 16  ;;  %v2647_v24 = vsel %vm415_vm0, %v2642_v48, %v2646_v46 }
 0x110   : > { %4291 = vmatmul.mubr.bf16.gmra.mrb[20].mxu0 %v4783_v40  ;;  %4150 = vmatprep.mubr.bf16.mxu1 %v4786_v41  ;;  %v5627_v40 = vld [vmem:[%s5282_s28 + $0x70] sm:$0xff]   ;;  %v4805_v41 = vld [vmem:[%s5282_s28 + $0x44] sm:$0xff]  }
 0x111   : > { %4310 = vmatprep.mubr.bf16.mxu0 %v2575_v42  ;;  %v2631_v42 = vsel %vm415_vm0, %v2626_v30, %v2630_v11  ;;  %v2652_v55 = vshll.u32 %v5627_v40, 16  ;;  %v2919_v6 = vrot.slane %v5627_v40, 1 }
 0x113   : > { %v2654_v50 = vrot.slane %v2652_v55, 1 }
 0x117   : > { %4151 = vmatmul.mubr.bf16.vlgmr.msra.gmra.mrb[0].mxu1 %v4789_v47  ;;  %v4818_v47 = vld [vmem:[#allocation5 + $0x238] sm:$0xff]  }
 0x118   : > { %4311 = vmatmul.mubr.bf16.vlgmr.msra.gmra.mrb[0].mxu0 %v2583_v39  ;;  %4382 = vmatpush3.bf16.msra.mxu1 %v4791_v25  ;;  %v4817_v39 = vld [vmem:[%s5282_s28 + $0x78] ss:$0 sps:$4 sm:$0x11]  }
 0x119   : > { %4335 = vmatpush3.bf16.msra.mxu0 %v4791_v25  ;;  %4375 = vmatprep.subr.bf16.mxu1 %v4792_v7  ;;  %v2632_v25 = vshrl.u32 %v5610_v53, 16  ;;  %v2660_v44 = vshll.u32 %v4817_v39, 16  ;;  %v2917_v53 = vrot.slane %v5624_v23, 1  ;;  %v2921_v16 = vrot.slane %v4817_v39, 1 }
 0x11a   : > { %4336 = vmatprep.subr.bf16.mxu0 %v4792_v7  ;;  %4154 = vmatprep.mubr.bf16.mxu1 %v4793_v63  ;;  %v2877_v63 = vld [vmem:[%s5282_s28 + $0x18] sm:$0xe]  ;;  %s4980_s28 = scalar_lea.vmem %s4979_s20, 6144 }
 0x11b   : > { %4314 = vmatprep.mubr.bf16.mxu0 %v2591_v51  ;;  %v2634_v27 = vor.u32 %v2632_v25, %v2630_v11  ;;  %v2656_v51 = vshrl.u32 %v5627_v40, 16  ;;  %v2662_v19 = vrot.slane %v2660_v44, 1  ;;  %v2918_v8 = vsel %vm915_vm1, %v2915_v57, %v2917_v53  ;;  %p4982_p13 = scmp.lt.s32.totalorder %s4980_s28, %s4974_s14 }
 0x11c   : > { %4383 = vmatpush3.bf16.msra.mxu1 %v4792_v7 }
 0x11d   : > { %4337 = vmatpush3.bf16.msra.mxu0 %v4792_v7  ;;  %4376 = vmatprep.subr.bf16.mxu1 %v4797_v32  ;;  %v2639_v43 = vsel %vm415_vm0, %v2634_v27, %v2638_v36  ;;  %v2650_v7 = vor.u32 %v2648_v45, %v2646_v46  ;;  %p4983_p3 = por %p4982_p13, %p4981_p12 }
 0x11e   : > { %4338 = vmatprep.subr.bf16.mxu0 %v4797_v32 }
 0x11f   : > { %4155 = vmatmul.mubr.bf16.gmra.mrb[4].mxu1 %v4795_v59  ;;  %v2655_v52 = vsel %vm415_vm0, %v2650_v7, %v2654_v50  ;;  %v2658_v59 = vor.u32 %v2656_v51, %v2654_v50  ;;  %p4984_p7 = pnand %p4983_p3, %p4977_p10 }
 0x120   : > { %4315 = vmatmul.mubr.bf16.gmra.mrb[4].mxu0 %v2599_v5  ;;  %4384 = vmatpush3.bf16.msra.mxu1 %v4797_v32 }
 0x121   : > { %4339 = vmatpush3.bf16.msra.mxu0 %v4797_v32  ;;  %4158 = vmatprep.mubr.bf16.mxu1 %v4798_v54  ;;  %v3796_v32 = vcombine.low %v2877_v63, %v5552_v15  ;;  %v2899_v54 = vrot.slane %v5560_v20, 1  ;;  %v2914_v20 = vsel %vm915_vm1, %v2911_v31, %v2913_v58 }
 0x122   : > { %4318 = vmatprep.mubr.bf16.mxu0 %v2607_v61  ;;  %4340 = vmatprep.subr.bf16.mxu0 %v4802_v33  ;;  %v2903_v61 = vrot.slane %v5573_v49, 1  ;;  %v2907_v49 = vrot.slane %v5586_v18, 1 }
 0x123   : > { %4377 = vmatprep.subr.bf16.mxu1 %v4802_v33  ;;  %v2898_v5 = vrot.slane %v3796_v32, 1  ;;  %v2902_v3 = vsel %vm915_vm1, %v2899_v54, %v2901_v56 }
 0x124   : > { %4385 = vmatpush3.bf16.msra.mxu1 %v4802_v33  ;;  %v2906_v9 = vsel %vm915_vm1, %v2903_v61, %v2905_v35  ;;  %v2910_v29 = vsel %vm915_vm1, %v2907_v49, %v2909_v60 }
 0x125   : > { %4341 = vmatpush3.bf16.msra.mxu0 %v4802_v33  ;;  %4378 = vmatprep.subr.bf16.mxu1 %v4807_v2  ;;  %v2663_v33 = vsel %vm415_vm0, %v2658_v59, %v2662_v19  ;;  %v2900_v15 = vsel %vm915_vm1, %v2898_v5, %v2899_v54 }
 0x126   : > { %4342 = vmatprep.subr.bf16.mxu0 %v4807_v2 }
 0x127   : > { %4159 = vmatmul.mubr.bf16.gmra.mrb[8].mxu1 %v4800_v13  ;;  %v2920_v13 = vsel %vm915_vm1, %v2917_v53, %v2919_v6 }
 0x128   : > { %4319 = vmatmul.mubr.bf16.gmra.mrb[8].mxu0 %v2615_v10  ;;  %4162 = vmatprep.mubr.bf16.mxu1 %v4803_v12  ;;  %v2908_v12 = vsel %vm915_vm1, %v2905_v35, %v2907_v49  ;;  %v2922_v10 = vsel %vm915_vm1, %v2919_v6, %v2921_v16  ;;  %v5714_v35 = vld [vmem:[%s6081_s3] ss:$0 sm:$0xff] }
 0x129   : > { %4322 = vmatprep.mubr.bf16.mxu0 %v2623_v17  ;;  %4343 = vmatpush3.bf16.msra.mxu0 %v4807_v2 }
 0x12a   : > { %4386 = vmatpush3.bf16.msra.mxu1 %v4807_v2  ;;  %4344 = vmatprep.subr.bf16.mxu0 %v4808_v21  ;;  %v2904_v2 = vsel %vm915_vm1, %v2901_v56, %v2903_v61  ;;  %v5709_v61 = vld [vmem:[%s6080_s2] ss:$0 sm:$0xff] }
 0x12b   : > { %4379 = vmatprep.subr.bf16.mxu1 %v4808_v21 }
 0x12d   : > { %4345 = vmatpush3.bf16.msra.mxu0 %v4808_v21 }
 0x12e   : > { %4387 = vmatpush3.bf16.msra.mxu1 %v4808_v21  ;;  %4346 = vmatprep.subr.bf16.mxu0 %v4813_v37 }
 0x12f   : > { %4163 = vmatmul.mubr.bf16.gmra.mrb[12].mxu1 %v4805_v41  ;;  %4380 = vmatprep.subr.bf16.mxu1 %v4813_v37 }
 0x130   : > { %4323 = vmatmul.mubr.bf16.gmra.mrb[12].mxu0 %v2631_v42  ;;  %4166 = vmatprep.mubr.bf16.mxu1 %v4809_v62 }
 0x131   : > { %4326 = vmatprep.mubr.bf16.mxu0 %v2639_v43  ;;  %4347 = vmatpush3.bf16.msra.mxu0 %v4813_v37 }
 0x132   : > { %4388 = vmatpush3.bf16.msra.mxu1 %v4813_v37  ;;  %4348 = vmatprep.subr.bf16.mxu0 %v4818_v47 }
 0x133   : > { %4381 = vmatprep.subr.bf16.mxu1 %v4818_v47 }
 0x135   : > { %4349 = vmatpush3.bf16.msra.mxu0 %v4818_v47 }
 0x136   : > { %4389 = vmatpush3.bf16.msra.mxu1 %v4818_v47 }
 0x137   : > { %4167 = vmatmul.mubr.bf16.gmra.mrb[16].mxu1 %v4811_v28 }
 0x138   : > { %4327 = vmatmul.mubr.bf16.gmra.mrb[16].mxu0 %v2647_v24  ;;  %4170 = vmatprep.mubr.bf16.mxu1 %v4814_v22 }
 0x139   : > { %4330 = vmatprep.mubr.bf16.mxu0 %v2655_v52 }
 0x13f   : > { %4171 = vmatmul.mubr.bf16.gmra.mrb[20].mxu1 %v4816_v14 }
 0x140   : > { %4331 = vmatmul.mubr.bf16.gmra.mrb[20].mxu0 %v2663_v33  ;;  %4362 = vmatprep.mubr.bf16.mxu1 %v2912_v1 }
 0x141   : > { %4350 = vmatprep.mubr.bf16.mxu0 %v2900_v15 }
 0x147   : > { %4363 = vmatmul.mubr.bf16.vlgmr.msra.gmra.mrb[24].mxu1 %v2914_v20 }
 0x148   : > { %4351 = vmatmul.mubr.bf16.vlgmr.msra.gmra.mrb[0].mxu0 %v2902_v3  ;;  %4366 = vmatprep.mubr.bf16.mxu1 %v2916_v4 }
 0x149   : > { %4354 = vmatprep.mubr.bf16.mxu0 %v2904_v2 }
 0x14f   : > { %4367 = vmatmul.mubr.bf16.gmra.mrb[28].mxu1 %v2918_v8 }
 0x150   : > { %4355 = vmatmul.mubr.bf16.gmra.mrb[4].mxu0 %v2906_v9  ;;  %4370 = vmatprep.mubr.bf16.mxu1 %v2920_v13 }
 0x151   : > { %4358 = vmatprep.mubr.bf16.mxu0 %v2908_v12 }
 0x157   : > { %4371 = vmatmul.mubr.bf16.gmra.mrb[32].mxu1 %v2922_v10 }
 0x158   : > { %4359 = vmatmul.mubr.bf16.gmra.mrb[8].mxu0 %v2910_v29 }
 0x1ea   : > { %v4152_v18 = vpop.f32.mrb[0].mxu1 }
 0x1eb   : > { %v1349_v0 = vpop.f32.mrb[1].mxu1 }
 0x1ec   : > { %v5670_v17 = vpop.f32.mrb[2].mxu1 }
 0x1ed   : > { %v5672_v21 = vpop.f32.mrb[3].mxu1 }
 0x1f2   : > { %v5674_v25 = vpop.f32.mrb[4].mxu1 }
 0x1f3   : > { %v5676_v26 = vpop.f32.mrb[5].mxu1 }
 0x1f4   : > { %v5678_v11 = vpop.f32.mrb[6].mxu1 }
 0x1f5   : > { %v5680_v23 = vpop.f32.mrb[7].mxu1 }
 0x1fa   : > { %v5682_v30 = vpop.f32.mrb[8].mxu1 }
 0x1fb   : > { %v5684_v27 = vpop.f32.mrb[9].mxu1 }
 0x1fc   : > { %v5686_v36 = vpop.f32.mrb[10].mxu1 }
 0x1fd   : > { %v5688_v37 = vpop.f32.mrb[11].mxu1 }
 0x202   : > { %v4164_v40 = vpop.f32.mrb[12].mxu1 }
 0x203   : > { %v4324_v41 = vpop.f32.mrb[12].mxu0  ;;  %v1397_v62 = vpop.f32.mrb[13].mxu1 }
 0x204   : > { %v4402_v34 = vadd.f32 %v4324_v41, %v4164_v40  ;;  %v2806_v42 = vpop.f32.mrb[13].mxu0  ;;  %v4165_v38 = vpop.f32.mrb[14].mxu1 }
 0x205   : > { %v4404_v43 = vadd.f32 %v2806_v42, %v1397_v62  ;;  %v4325_v45 = vpop.f32.mrb[14].mxu0  ;;  %v1400_v55 = vpop.f32.mrb[15].mxu1 }
 0x206   : > { %v4406_v47 = vadd.f32 %v4325_v45, %v4165_v38  ;;  %v2809_v46 = vpop.f32.mrb[15].mxu0 }
 0x207   : > { %v4408_v48 = vadd.f32 %v2809_v46, %v1400_v55 }
 0x20a   : > { %v4168_v39 = vpop.f32.mrb[16].mxu1 }
 0x20b   : > { %v4328_v7 = vpop.f32.mrb[16].mxu0  ;;  %v1413_v50 = vpop.f32.mrb[17].mxu1 }
 0x20c   : > { %v5690_v28 = vadd.f32 %v4328_v7, %v4168_v39  ;;  %v2822_v63 = vpop.f32.mrb[17].mxu0  ;;  %v4169_v22 = vpop.f32.mrb[18].mxu1 }
 0x20d   : > { %v5692_v24 = vadd.f32 %v2822_v63, %v1413_v50  ;;  %v4329_v51 = vpop.f32.mrb[18].mxu0  ;;  %v1416_v44 = vpop.f32.mrb[19].mxu1 }
 0x20e   : > { %v5694_v52 = vadd.f32 %v4329_v51, %v4169_v22  ;;  %v2825_v32 = vpop.f32.mrb[19].mxu0 }
 0x20f   : > { %v5696_v59 = vadd.f32 %v2825_v32, %v1416_v44 }
 0x212   : > { %v4172_v19 = vpop.f32.mrb[20].mxu1 }
 0x213   : > { %v4332_v60 = vpop.f32.mrb[20].mxu0  ;;  %v1429_v31 = vpop.f32.mrb[21].mxu1 }
 0x214   : > { %v5698_v5 = vadd.f32 %v4332_v60, %v4172_v19  ;;  %v2838_v54 = vpop.f32.mrb[21].mxu0  ;;  %v4173_v14 = vpop.f32.mrb[22].mxu1 }
 0x215   : > { %v5700_v33 = vadd.f32 %v2838_v54, %v1429_v31  ;;  %v4333_v1 = vpop.f32.mrb[22].mxu0  ;;  %v1432_v15 = vpop.f32.mrb[23].mxu1 }
 0x216   : > { %v5702_v58 = vadd.f32 %v4333_v1, %v4173_v14  ;;  %v2841_v56 = vpop.f32.mrb[23].mxu0 }
 0x217   : > { %v5704_v57 = vadd.f32 %v2841_v56, %v1432_v15 }
 0x21a   : > { %v4364_v20 = vpop.f32.mrb[24].mxu1 }
 0x21b   : > { %v4352_v3 = vpop.f32.mrb[0].mxu0  ;;  %v4403_v4 = vadd.f32 %v4402_v34, %v4364_v20  ;;  %v3065_v2 = vpop.f32.mrb[25].mxu1 }
 0x21c   : > { %v4390_v53 = vadd.f32 %v4352_v3, %v4152_v18  ;;  %v3017_v6 = vpop.f32.mrb[1].mxu0  ;;  %v4405_v49 = vadd.f32 %v4404_v43, %v3065_v2  ;;  %v4365_v8 = vpop.f32.mrb[26].mxu1 }
 0x21d   : > { %v3157_v9 = vmul.f32 %v4403_v4, %v5709_v61  ;;  %v4391_v13 = vadd.f32 %v3017_v6, %v1349_v0  ;;  %v4353_v12 = vpop.f32.mrb[2].mxu0  ;;  %v4407_v16 = vadd.f32 %v4406_v47, %v4365_v8  ;;  %v3068_v10 = vpop.f32.mrb[27].mxu1 }
 0x21e   : > { %v3145_v29 = vmul.f32 %v4390_v53, %v5709_v61  ;;  %v3155_v40 = vmul.f32 %v4405_v49, %v5709_v61  ;;  %v4392_v18 = vadd.f32 %v4353_v12, %v5670_v17  ;;  %v3020_v41 = vpop.f32.mrb[3].mxu0  ;;  %v4409_v62 = vadd.f32 %v4408_v48, %v3068_v10 }
 0x21f   : > { %v5721_v34 = vadd.f32 %v5714_v35, %v3157_v9  ;;  %v3143_v42 = vmul.f32 %v4391_v13, %v5709_v61  ;;  %v3158_v38 = vmul.f32 %v4407_v16, %v5709_v61  ;;  %v4393_v0 = vadd.f32 %v3020_v41, %v5672_v21 }
 0x220   : > { %v5727_v43 = vadd.f32 %v5714_v35, %v3145_v29  ;;  %v5730_v45 = vadd.f32 %v5714_v35, %v3155_v40  ;;  %v3146_v55 = vmul.f32 %v4392_v18, %v5709_v61  ;;  %v3156_v39 = vmul.f32 %v4409_v62, %v5709_v61 }
 0x221   : > { %v3212_v17 = vmin.f32 %v5721_v34, 20.0  ;;  %v5735_v47 = vadd.f32 %v5714_v35, %v3143_v42  ;;  %v5738_v46 = vadd.f32 %v5714_v35, %v3158_v38  ;;  %v3144_v56 = vmul.f32 %v4393_v0, %v5709_v61 }
 0x222   : > { %v3200_v48 = vmin.f32 %v5727_v43, 20.0  ;;  %v3210_v21 = vmin.f32 %v5730_v45, 20.0  ;;  %v4368_v7 = vpop.f32.mrb[28].mxu1  ;;  %v5745_v22 = vadd.f32 %v5714_v35, %v3146_v55  ;;  %v5751_v20 = vadd.f32 %v5714_v35, %v3156_v39 }
 0x223   : > { %v3250_v50 = vmul.f32 1.442695, %v3212_v17  ;;  %v3198_v63 = vmin.f32 %v5735_v47, 20.0  ;;  %v4356_v51 = vpop.f32.mrb[4].mxu0  ;;  %v3081_v44 = vpop.f32.mrb[29].mxu1  ;;  %v3213_v60 = vmin.f32 %v5738_v46, 20.0  ;;  %v4411_v6 = vadd.f32 %v5690_v28, %v4368_v7 }
 0x224   : > { %v3226_v32 = vmul.f32 1.442695, %v3200_v48  ;;  %v3246_v19 = vmul.f32 1.442695, %v3210_v21  ;;  %v3201_v54 = vmin.f32 %v5745_v22, 20.0  ;;  %v3033_v14 = vpop.f32.mrb[5].mxu0  ;;  %v4394_v53 = vadd.f32 %v4356_v51, %v5674_v25 }
 0x225   : > { %4820 = vpow2.f32 %v3250_v50  ;;  %v3222_v31 = vmul.f32 1.442695, %v3198_v63  ;;  %v4369_v1 = vpop.f32.mrb[30].mxu1  ;;  %v3252_v15 = vmul.f32 1.442695, %v3213_v60  ;;  %v4357_v3 = vpop.f32.mrb[6].mxu0  ;;  %v5758_v8 = vadd.f32 %v5714_v35, %v3144_v56 }
 0x226   : > { %4822 = vpow2.f32 %v3226_v32  ;;  %v5753_v4 = vpop.f32.mrb[31].mxu1  ;;  %v3228_v2 = vmul.f32 1.442695, %v3201_v54  ;;  %v3036_v49 = vpop.f32.mrb[7].mxu0  ;;  %v3211_v9 = vmin.f32 %v5751_v20, 20.0  ;;  %v3149_v13 = vmul.f32 %v4394_v53, %v5709_v61 }
 0x227   : > { %4824 = vpow2.f32 %v3222_v31  ;;  %v3161_v12 = vmul.f32 %v4411_v6, %v5709_v61  ;;  %v4395_v16 = vadd.f32 %v3033_v14, %v5676_v26  ;;  %v3199_v10 = vmin.f32 %v5758_v8, 20.0 }
 0x228   : > { %4826 = vpow2.f32 %v3246_v19  ;;  %v3248_v25 = vmul.f32 1.442695, %v3211_v9  ;;  %v5768_v28 = vadd.f32 %v5714_v35, %v3149_v13  ;;  %v4413_v41 = vadd.f32 %v5692_v24, %v3081_v44 }
 0x229   : > { %4828 = vpow2.f32 %v3228_v2  ;;  %v5771_v40 = vadd.f32 %v5714_v35, %v3161_v12  ;;  %v3147_v18 = vmul.f32 %v4395_v16, %v5709_v61  ;;  %v3224_v26 = vmul.f32 1.442695, %v3199_v10 }
 0x22a   : > { %4830 = vpow2.f32 %v3252_v15  ;;  %v5765_v29 = vpop.f32.mrb[32].mxu1  ;;  %v4396_v38 = vadd.f32 %v4357_v3, %v5678_v11  ;;  %v4415_v0 = vadd.f32 %v5694_v52, %v4369_v1  ;;  %v3204_v48 = vmin.f32 %v5768_v28, 20.0 }
 0x22b   : > { %v5775_v62 = vpop.f32.mrb[8].mxu0  ;;  %v5777_v42 = vpop.f32.mrb[33].mxu1  ;;  %4832 = vpow2.f32 %v3248_v25  ;;  %v3216_v21 = vmin.f32 %v5771_v40, 20.0  ;;  %v3159_v7 = vmul.f32 %v4413_v41, %v5709_v61  ;;  %v5795_v51 = vadd.f32 %v3036_v49, %v5680_v23 }
 0x22c   : > { %v5781_v55 = vpop.f32.mrb[9].mxu0  ;;  %v5783_v17 = vpop.f32.mrb[34].mxu1  ;;  %4834 = vpow2.f32 %v3224_v26  ;;  %v3234_v63 = vmul.f32 1.442695, %v3204_v48  ;;  %v5798_v19 = vadd.f32 %v5714_v35, %v3147_v18  ;;  %v3150_v54 = vmul.f32 %v4396_v38, %v5709_v61 }
 0x22d   : > { %v5787_v39 = vpop.f32.mrb[10].mxu0  ;;  %v5789_v24 = vpop.f32.mrb[35].mxu1  ;;  %v3258_v52 = vmul.f32 1.442695, %v3216_v21  ;;  %v5802_v56 = vadd.f32 %v5714_v35, %v3159_v7  ;;  %v3162_v53 = vmul.f32 %v4415_v0, %v5709_v61  ;;  %vm3428_vm2 = vcmp.gt.f32.partialorder %v5721_v34, 20.0 }
 0x22e   : > { %v5792_v50 = vpop.f32.mrb[11].mxu0  ;;  %4836 = vpow2.f32 %v3234_v63  ;;  %v3202_v12 = vmin.f32 %v5798_v19, 20.0  ;;  %v5807_v18 = vadd.f32 %v5714_v35, %v3150_v54  ;;  %vm3416_vm3 = vcmp.gt.f32.partialorder %v5727_v43, 20.0 }
 0x22f   : > { %v4821_v11 = vpop.eup %4820  ;;  %4838 = vpow2.f32 %v3258_v52  ;;  %v3214_v48 = vmin.f32 %v5802_v56, 20.0  ;;  %v5811_v7 = vadd.f32 %v5714_v35, %v3162_v53  ;;  %vm3414_vm4 = vcmp.gt.f32.partialorder %v5735_v47, 20.0 }
 0x230   : > { %v4823_v44 = vpop.eup %4822  ;;  %v3284_v32 = vadd.f32 1.0, %v4821_v11  ;;  %vm3426_vm5 = vcmp.gt.f32.partialorder %v5730_v45, 20.0  ;;  %vm3417_vm6 = vcmp.gt.f32.partialorder %v5745_v22, 20.0  ;;  %vm3429_vm7 = vcmp.gt.f32.partialorder %v5738_v46, 20.0 }
 0x231   : > { %v4825_v60 = vpop.eup %4824  ;;  %v3272_v31 = vadd.f32 1.0, %v4823_v44  ;;  %v3230_v44 = vmul.f32 1.442695, %v3202_v12  ;;  %v3217_v53 = vmin.f32 %v5811_v7, 20.0  ;;  %vm3427_vm8 = vcmp.gt.f32.partialorder %v5751_v20, 20.0 }
 0x232   : > { %v4827_v14 = vpop.eup %4826  ;;  %v3308_v1 = vmul.f32 %v3284_v32, %v3284_v32  ;;  %v3270_v15 = vadd.f32 1.0, %v4825_v60  ;;  %vm3415_vm9 = vcmp.gt.f32.partialorder %v5758_v8, 20.0  ;;  %vm3420_vm10 = vcmp.gt.f32.partialorder %v5768_v28, 20.0 }
 0x233   : > { %v4829_v3 = vpop.eup %4828  ;;  %v3296_v23 = vmul.f32 %v3272_v31, %v3272_v31  ;;  %v3282_v2 = vadd.f32 1.0, %v4827_v14  ;;  %v3254_v14 = vmul.f32 1.442695, %v3214_v48  ;;  %v3260_v48 = vmul.f32 1.442695, %v3217_v53 }
 0x234   : > { %v4831_v6 = vpop.eup %4830  ;;  %v3356_v49 = vadd.f32 1.0, %v3308_v1  ;;  %v3294_v9 = vmul.f32 %v3270_v15, %v3270_v15  ;;  %v3273_v13 = vadd.f32 1.0, %v4829_v3  ;;  %v3821_v32 = vadd.f32 -1.0, %v3308_v1 }
 0x235   : > { %v3344_v16 = vadd.f32 1.0, %v3296_v23  ;;  %v3306_v10 = vmul.f32 %v3282_v2, %v3282_v2  ;;  %v3285_v25 = vadd.f32 1.0, %v4831_v6  ;;  %v4833_v41 = vpop.eup %4832  ;;  %v3205_v15 = vmin.f32 %v5807_v18, 20.0 }
 0x236   : > { %4840 = vrcp.f32 %v3356_v49  ;;  %v3342_v26 = vadd.f32 1.0, %v3294_v9  ;;  %v3297_v38 = vmul.f32 %v3273_v13, %v3273_v13  ;;  %v4835_v11 = vpop.eup %4834  ;;  %v3283_v52 = vadd.f32 1.0, %v4833_v41 }
 0x237   : > { %4842 = vrcp.f32 %v3344_v16  ;;  %v3354_v0 = vadd.f32 1.0, %v3306_v10  ;;  %v3309_v21 = vmul.f32 %v3285_v25, %v3285_v25  ;;  %v3271_v31 = vadd.f32 1.0, %v4835_v11 }
 0x238   : > { %4844 = vrcp.f32 %v3342_v26  ;;  %v3345_v63 = vadd.f32 1.0, %v3297_v38  ;;  %v3307_v54 = vmul.f32 %v3283_v52, %v3283_v52  ;;  %v4837_v3 = vpop.eup %4836  ;;  %v3809_v2 = vadd.f32 -1.0, %v3296_v23 }
 0x239   : > { %4846 = vrcp.f32 %v3354_v0  ;;  %v3357_v60 = vadd.f32 1.0, %v3309_v21  ;;  %v3295_v6 = vmul.f32 %v3271_v31, %v3271_v31  ;;  %v4839_v49 = vpop.eup %4838  ;;  %v3807_v13 = vadd.f32 -1.0, %v3294_v9 }
 0x23a   : > { %4848 = vrcp.f32 %v3345_v63  ;;  %v3355_v1 = vadd.f32 1.0, %v3307_v54  ;;  %v3276_v12 = vadd.f32 1.0, %v4837_v3  ;;  %v3819_v16 = vadd.f32 -1.0, %v3306_v10 }
 0x23b   : > { %4850 = vrcp.f32 %v3357_v60  ;;  %v3343_v25 = vadd.f32 1.0, %v3295_v6  ;;  %v3288_v41 = vadd.f32 1.0, %v4839_v49  ;;  %v3236_v26 = vmul.f32 1.442695, %v3205_v15 }
 0x23c   : > { %4852 = vpow2.f32 %v3230_v44  ;;  %v5818_v23 = vmul.f32 %v3276_v12, %v3276_v12  ;;  %v3810_v9 = vadd.f32 -1.0, %v3297_v38  ;;  %v3148_v10 = vmul.f32 %v5795_v51, %v5709_v61 }
 0x23d   : > { %4854 = vpow2.f32 %v3254_v14  ;;  %v5822_v0 = vmul.f32 %v3288_v41, %v3288_v41  ;;  %v3822_v63 = vadd.f32 -1.0, %v3309_v21  ;;  %v4417_v44 = vadd.f32 %v5696_v59, %v5753_v4 }
 0x23e   : > { %4856 = vrcp.f32 %v3355_v1  ;;  %v3348_v52 = vadd.f32 1.0, %v5818_v23  ;;  %v3820_v38 = vadd.f32 -1.0, %v3307_v54  ;;  %v5833_v3 = vadd.f32 %v5714_v35, %v3148_v10 }
 0x23f   : > { %4858 = vrcp.f32 %v3343_v25  ;;  %v3360_v14 = vadd.f32 1.0, %v5822_v0  ;;  %v3160_v21 = vmul.f32 %v4417_v44, %v5709_v61  ;;  %v5839_v4 = vadd.f32 %v5775_v62, %v5682_v30 }
 0x240   : > { %v4841_v11 = vpop.eup %4840  ;;  %4860 = vpow2.f32 %v3236_v26  ;;  %v3808_v1 = vadd.f32 -1.0, %v3295_v6  ;;  %v3203_v12 = vmin.f32 %v5833_v3, 20.0  ;;  %vm3432_vm11 = vcmp.gt.f32.partialorder %v5771_v40, 20.0 }
 0x241   : > { %v4843_v60 = vpop.eup %4842  ;;  %v3404_v31 = vmul.f32 %v4841_v11, %v3821_v32  ;;  %4862 = vpow2.f32 %v3260_v48  ;;  %v5849_v30 = vadd.f32 %v5714_v35, %v3160_v21  ;;  %vm3418_vm12 = vcmp.gt.f32.partialorder %v5798_v19, 20.0 }
 0x242   : > { %v4845_v15 = vpop.eup %4844  ;;  %v3392_v51 = vmul.f32 %v4843_v60, %v3809_v2  ;;  %4864 = vrcp.f32 %v3348_v52  ;;  %v3232_v48 = vmul.f32 1.442695, %v3203_v12  ;;  %vm3430_vm13 = vcmp.gt.f32.partialorder %v5802_v56, 20.0 }
 0x243   : > { %v4847_v53 = vpop.eup %4846  ;;  %v3452_v49 = vmul.f32 %v3404_v31, %v5721_v34  ;;  %v3390_v59 = vmul.f32 %v4845_v15, %v3807_v13  ;;  %4866 = vrcp.f32 %v3360_v14  ;;  %v3215_v52 = vmin.f32 %v5849_v30, 20.0 }
 0x244   : > { %v4849_v32 = vpop.eup %4848  ;;  %v3440_v54 = vmul.f32 %v3392_v51, %v5727_v43  ;;  %v3402_v2 = vmul.f32 %v4847_v53, %v3819_v16  ;;  %4868 = vpow2.f32 %v3232_v48  ;;  %vm3421_vm14 = vcmp.gt.f32.partialorder %v5807_v18, 20.0 }
 0x245   : > { %v4851_v25 = vpop.eup %4850  ;;  %v3476_v13 = vsel %vm3428_vm2, %v5721_v34, %v3452_v49  ;;  %v3438_v41 = vmul.f32 %v3390_v59, %v5735_v47  ;;  %v3393_v26 = vmul.f32 %v4849_v32, %v3810_v9  ;;  %v3813_v49 = vadd.f32 -1.0, %v5818_v23 }
 0x246   : > { %v4853_v62 = vpop.eup %4852  ;;  %v3464_v6 = vsel %vm3416_vm3, %v5727_v43, %v3440_v54  ;;  %3500 = vst [vmem:[%s5856_s6 + $0x70] sm:$0xff] %v3476_v13  ;;  %v3450_v34 = vmul.f32 %v3402_v2, %v5730_v45  ;;  %v3405_v16 = vmul.f32 %v4851_v25, %v3822_v63  ;;  %v3256_v12 = vmul.f32 1.442695, %v3215_v52 }
 0x247   : > { %v4855_v9 = vpop.eup %4854  ;;  %3488 = vst [vmem:[%s5856_s6 + $0x10] sm:$0xff] %v3464_v6  ;;  %v3462_v10 = vsel %vm3414_vm4, %v5735_v47, %v3438_v41  ;;  %v3441_v43 = vmul.f32 %v3393_v26, %v5745_v22  ;;  %v3274_v11 = vadd.f32 1.0, %v4853_v62  ;;  %v3825_v13 = vadd.f32 -1.0, %v5822_v0 }
 0x248   : > { %v4857_v44 = vpop.eup %4856  ;;  %3486 = vst [vmem:[%s5856_s6] sm:$0xff] %v3462_v10  ;;  %v3474_v60 = vsel %vm3426_vm5, %v5730_v45, %v3450_v34  ;;  %v3453_v63 = vmul.f32 %v3405_v16, %v5738_v46  ;;  %v3286_v31 = vadd.f32 1.0, %v4855_v9  ;;  %vm3433_vm15 = vcmp.gt.f32.partialorder %v5811_v7, 20.0 }
 0x249   : > { %v4859_v14 = vpop.eup %4858  ;;  %3498 = vst [vmem:[%s5856_s6 + $0x60] sm:$0xff] %v3474_v60  ;;  %v3465_v47 = vsel %vm3417_vm6, %v5745_v22, %v3441_v43  ;;  %v3403_v15 = vmul.f32 %v4857_v44, %v3820_v38  ;;  %v3298_v51 = vmul.f32 %v3274_v11, %v3274_v11  ;;  %v4419_v43 = vadd.f32 %v5698_v5, %v5765_v29 }
 0x24a   : > { %v4861_v21 = vpop.eup %4860  ;;  %3489 = vst [vmem:[%s5856_s6 + $0x18] sm:$0xff] %v3465_v47  ;;  %v3477_v45 = vsel %vm3429_vm7, %v5738_v46, %v3453_v63  ;;  %v3391_v53 = vmul.f32 %v4859_v14, %v3808_v1  ;;  %v3310_v59 = vmul.f32 %v3286_v31, %v3286_v31  ;;  %v4399_v11 = vadd.f32 %v5781_v55, %v5684_v27 }
 0x24b   : > { %v4863_v32 = vpop.eup %4862  ;;  %3501 = vst [vmem:[%s5856_s6 + $0x78] sm:$0xff] %v3477_v45  ;;  %v3451_v54 = vmul.f32 %v3403_v15, %v5751_v20  ;;  %v3346_v22 = vadd.f32 1.0, %v3298_v51  ;;  %v3277_v2 = vadd.f32 1.0, %v4861_v21  ;;  %v3165_v5 = vmul.f32 %v4419_v43, %v5709_v61 }
 0x24c   : > { %v4865_v38 = vpop.eup %4864  ;;  %v3439_v25 = vmul.f32 %v3391_v53, %v5758_v8  ;;  %v3358_v41 = vadd.f32 1.0, %v3310_v59  ;;  %v3289_v46 = vadd.f32 1.0, %v4863_v32  ;;  %v3151_v29 = vmul.f32 %v4399_v11, %v5709_v61 }
 0x24d   : > { %v4867_v1 = vpop.eup %4866  ;;  %v3475_v23 = vsel %vm3427_vm8, %v5751_v20, %v3451_v54  ;;  %v3396_v26 = vmul.f32 %v4865_v38, %v3813_v49  ;;  %4870 = vrcp.f32 %v3346_v22  ;;  %v3301_v62 = vmul.f32 %v3277_v2, %v3277_v2 }
 0x24e   : > { %v3463_v6 = vsel %vm3415_vm9, %v5758_v8, %v3439_v25  ;;  %3499 = vst [vmem:[%s5856_s6 + $0x68] sm:$0xff] %v3475_v23  ;;  %v3408_v34 = vmul.f32 %v4867_v1, %v3825_v13  ;;  %4872 = vrcp.f32 %v3358_v41  ;;  %v3313_v16 = vmul.f32 %v3289_v46, %v3289_v46  ;;  %v4869_v52 = vpop.eup %4868 }
 0x24f   : > { %3487 = vst [vmem:[%s5856_s6 + $0x8] sm:$0xff] %v3463_v6  ;;  %v3444_v0 = vmul.f32 %v3396_v26, %v5768_v28  ;;  %v3349_v48 = vadd.f32 1.0, %v3301_v62  ;;  %4874 = vpow2.f32 %v3256_v12  ;;  %v3153_v8 = vmul.f32 %v5839_v4, %v5709_v61 }
 0x250   : > { %v3456_v20 = vmul.f32 %v3408_v34, %v5771_v40  ;;  %v3361_v9 = vadd.f32 1.0, %v3313_v16  ;;  %v4421_v4 = vadd.f32 %v5700_v33, %v5777_v42  ;;  %v4400_v27 = vadd.f32 %v5787_v39, %v5686_v36 }
 0x251   : > { %v3468_v10 = vsel %vm3420_vm10, %v5768_v28, %v3444_v0  ;;  %4876 = vrcp.f32 %v3349_v48  ;;  %v5907_v60 = vadd.f32 %v5714_v35, %v3153_v8  ;;  %v3275_v28 = vadd.f32 1.0, %v4869_v52 }
 0x252   : > { %3492 = vst [vmem:[%s5856_s6 + $0x30] sm:$0xff] %v3468_v10  ;;  %v3480_v44 = vsel %vm3432_vm11, %v5771_v40, %v3456_v20  ;;  %4878 = vrcp.f32 %v3361_v9  ;;  %v3163_v55 = vmul.f32 %v4421_v4, %v5709_v61  ;;  %v4423_v33 = vadd.f32 %v5702_v58, %v5783_v17 }
 0x253   : > { %3504 = vst [vmem:[%s5856_s6 + $0x90] sm:$0xff] %v3480_v44  ;;  %v3208_v40 = vmin.f32 %v5907_v60, 20.0  ;;  %v3811_v42 = vadd.f32 -1.0, %v3298_v51  ;;  %v3299_v63 = vmul.f32 %v3275_v28, %v3275_v28  ;;  %v5923_v31 = vadd.f32 %v5714_v35, %v3165_v5 }
 0x254   : > { %v5926_v14 = vadd.f32 %v5714_v35, %v3151_v29  ;;  %v3823_v47 = vadd.f32 -1.0, %v3310_v59  ;;  %v5929_v36 = vadd.f32 %v5714_v35, %v3163_v55  ;;  %v4401_v39 = vadd.f32 %v5792_v50, %v5688_v37 }
 0x255   : > { %v3242_v15 = vmul.f32 1.442695, %v3208_v40  ;;  %v3814_v45 = vadd.f32 -1.0, %v3301_v62  ;;  %v3347_v53 = vadd.f32 1.0, %v3299_v63  ;;  %v3220_v58 = vmin.f32 %v5923_v31, 20.0 }
 0x256   : > { %v3154_v17 = vmul.f32 %v4400_v27, %v5709_v61  ;;  %v3826_v32 = vadd.f32 -1.0, %v3313_v16  ;;  %v3206_v59 = vmin.f32 %v5926_v14, 20.0  ;;  %v3218_v37 = vmin.f32 %v5929_v36, 20.0 }
 0x257   : > { %v4871_v21 = vpop.eup %4870  ;;  %4880 = vpow2.f32 %v3242_v15  ;;  %v3266_v2 = vmul.f32 1.442695, %v3220_v58  ;;  %v3166_v25 = vmul.f32 %v4423_v33, %v5709_v61  ;;  %v4425_v43 = vadd.f32 %v5704_v57, %v5789_v24 }
 0x258   : > { %v4873_v51 = vpop.eup %4872  ;;  %v3394_v49 = vmul.f32 %v4871_v21, %v3811_v42  ;;  %4882 = vrcp.f32 %v3347_v53  ;;  %v3238_v38 = vmul.f32 1.442695, %v3206_v59  ;;  %v3262_v46 = vmul.f32 1.442695, %v3218_v37 }
 0x259   : > { %v4875_v54 = vpop.eup %4874  ;;  %v3406_v22 = vmul.f32 %v4873_v51, %v3823_v47  ;;  %4884 = vpow2.f32 %v3266_v2  ;;  %v5941_v1 = vadd.f32 %v5714_v35, %v3154_v17  ;;  %v5956_v8 = vadd.f32 %v5714_v35, %v3166_v25 }
 0x25a   : > { %v3442_v50 = vmul.f32 %v3394_v49, %v5798_v19  ;;  %v3287_v12 = vadd.f32 1.0, %v4875_v54  ;;  %4886 = vpow2.f32 %v3238_v38  ;;  %v3812_v4 = vadd.f32 -1.0, %v3299_v63 }
 0x25b   : > { %v4877_v13 = vpop.eup %4876  ;;  %v3454_v41 = vmul.f32 %v3406_v22, %v5802_v56  ;;  %4888 = vpow2.f32 %v3262_v46  ;;  %v3209_v0 = vmin.f32 %v5941_v1, 20.0  ;;  %v3221_v52 = vmin.f32 %v5956_v8, 20.0 }
 0x25c   : > { %v4879_v23 = vpop.eup %4878  ;;  %v3466_v26 = vsel %vm3418_vm12, %v5798_v19, %v3442_v50  ;;  %v3397_v62 = vmul.f32 %v4877_v13, %v3814_v45  ;;  %v3311_v6 = vmul.f32 %v3287_v12, %v3287_v12  ;;  %vm3419_vm0 = vcmp.gt.f32.partialorder %v5833_v3, 20.0 }
 0x25d   : > { %3490 = vst [vmem:[%s5856_s6 + $0x20] sm:$0xff] %v3466_v26  ;;  %v3478_v34 = vsel %vm3430_vm13, %v5802_v56, %v3454_v41  ;;  %v3409_v16 = vmul.f32 %v4879_v23, %v3826_v32  ;;  %v3244_v9 = vmul.f32 1.442695, %v3209_v0  ;;  %v3152_v56 = vmul.f32 %v4401_v39, %v5709_v61 }
 0x25e   : > { %3502 = vst [vmem:[%s5856_s6 + $0x80] sm:$0xff] %v3478_v34  ;;  %v3445_v48 = vmul.f32 %v3397_v62, %v5807_v18  ;;  %v3359_v19 = vadd.f32 1.0, %v3311_v6  ;;  %v3268_v27 = vmul.f32 1.442695, %v3221_v52  ;;  %v3824_v58 = vadd.f32 -1.0, %v3311_v6 }
 0x25f   : > { %v3457_v20 = vmul.f32 %v3409_v16, %v5811_v7  ;;  %v5968_v28 = vadd.f32 %v5714_v35, %v3152_v56  ;;  %vm3431_vm1 = vcmp.gt.f32.partialorder %v5849_v30, 20.0  ;;  %vm3424_vm2 = vcmp.gt.f32.partialorder %v5907_v60, 20.0 }
 0x260   : > { %v3469_v10 = vsel %vm3421_vm14, %v5807_v18, %v3445_v48  ;;  %4890 = vrcp.f32 %v3359_v19  ;;  %v3164_v18 = vmul.f32 %v4425_v43, %v5709_v61  ;;  %vm3436_vm3 = vcmp.gt.f32.partialorder %v5923_v31, 20.0 }
 0x261   : > { %3493 = vst [vmem:[%s5856_s6 + $0x38] sm:$0xff] %v3469_v10  ;;  %v3481_v11 = vsel %vm3433_vm15, %v5811_v7, %v3457_v20  ;;  %4892 = vpow2.f32 %v3244_v9  ;;  %v4881_v44 = vpop.eup %4880  ;;  %v3207_v57 = vmin.f32 %v5968_v28, 20.0  ;;  %vm3422_vm4 = vcmp.gt.f32.partialorder %v5926_v14, 20.0 }
 0x262   : > { %3505 = vst [vmem:[%s5856_s6 + $0x98] sm:$0xff] %v3481_v11  ;;  %v4883_v5 = vpop.eup %4882  ;;  %v3280_v29 = vadd.f32 1.0, %v4881_v44  ;;  %v5973_v24 = vadd.f32 %v5714_v35, %v3164_v18  ;;  %4894 = vpow2.f32 %v3268_v27  ;;  %vm3434_vm5 = vcmp.gt.f32.partialorder %v5929_v36, 20.0 }
 0x263   : > { %v3395_v40 = vmul.f32 %v4883_v5, %v3812_v4  ;;  %v4885_v7 = vpop.eup %4884  ;;  %v3240_v47 = vmul.f32 1.442695, %v3207_v57  ;;  %vm3425_vm6 = vcmp.gt.f32.partialorder %v5941_v1, 20.0  ;;  %vm3437_vm7 = vcmp.gt.f32.partialorder %v5956_v8, 20.0 }
 0x264   : > { %v3304_v55 = vmul.f32 %v3280_v29, %v3280_v29  ;;  %v4887_v33 = vpop.eup %4886  ;;  %v3292_v63 = vadd.f32 1.0, %v4885_v7  ;;  %v3219_v61 = vmin.f32 %v5973_v24, 20.0  ;;  %vm3423_vm8 = vcmp.gt.f32.partialorder %v5968_v28, 20.0 }
 0x265   : > { %v3443_v42 = vmul.f32 %v3395_v40, %v5833_v3  ;;  %v4889_v15 = vpop.eup %4888  ;;  %v3278_v21 = vadd.f32 1.0, %v4887_v33  ;;  %4896 = vpow2.f32 %v3240_v47  ;;  %vm3435_vm9 = vcmp.gt.f32.partialorder %v5973_v24, 20.0 }
 0x266   : > { %v3352_v39 = vadd.f32 1.0, %v3304_v55  ;;  %v3316_v35 = vmul.f32 %v3292_v63, %v3292_v63  ;;  %v3290_v53 = vadd.f32 1.0, %v4889_v15  ;;  %v3264_v51 = vmul.f32 1.442695, %v3219_v61 }
 0x267   : > { %v3467_v45 = vsel %vm3419_vm0, %v5833_v3, %v3443_v42  ;;  %v3302_v17 = vmul.f32 %v3278_v21, %v3278_v21  ;;  %v3817_v23 = vadd.f32 -1.0, %v3304_v55 }
 0x268   : > { %3491 = vst [vmem:[%s5856_s6 + $0x28] sm:$0xff] %v3467_v45  ;;  %4898 = vrcp.f32 %v3352_v39  ;;  %v3364_v32 = vadd.f32 1.0, %v3316_v35  ;;  %v3314_v59 = vmul.f32 %v3290_v53, %v3290_v53  ;;  %v3829_v48 = vadd.f32 -1.0, %v3316_v35 }
 0x269   : > { %v3350_v2 = vadd.f32 1.0, %v3302_v17  ;;  %4900 = vpow2.f32 %v3264_v51  ;;  %v3815_v56 = vadd.f32 -1.0, %v3302_v17 }
 0x26a   : > { %v4891_v49 = vpop.eup %4890  ;;  %4902 = vrcp.f32 %v3364_v32  ;;  %v3362_v37 = vadd.f32 1.0, %v3314_v59  ;;  %v3827_v11 = vadd.f32 -1.0, %v3314_v59 }
 0x26b   : > { %v4893_v54 = vpop.eup %4892  ;;  %v3407_v22 = vmul.f32 %v4891_v49, %v3824_v58  ;;  %4904 = vrcp.f32 %v3350_v2 }
 0x26c   : > { %v3281_v50 = vadd.f32 1.0, %v4893_v54  ;;  %4906 = vrcp.f32 %v3362_v37  ;;  %v4895_v38 = vpop.eup %4894 }
 0x26d   : > { %v3455_v3 = vmul.f32 %v3407_v22, %v5849_v30  ;;  %v3293_v41 = vadd.f32 1.0, %v4895_v38 }
 0x26e   : > { %v3305_v12 = vmul.f32 %v3281_v50, %v3281_v50 }
 0x26f   : > { %v3479_v25 = vsel %vm3431_vm1, %v5849_v30, %v3455_v3  ;;  %v4897_v46 = vpop.eup %4896  ;;  %v3317_v26 = vmul.f32 %v3293_v41, %v3293_v41 }
 0x270   : > { %3503 = vst [vmem:[%s5856_s6 + $0x88] sm:$0xff] %v3479_v25  ;;  %v3353_v13 = vadd.f32 1.0, %v3305_v12  ;;  %v3279_v6 = vadd.f32 1.0, %v4897_v46  ;;  %v3818_v55 = vadd.f32 -1.0, %v3305_v12 }
 0x271   : > { %v3365_v16 = vadd.f32 1.0, %v3317_v26  ;;  %v3830_v61 = vadd.f32 -1.0, %v3317_v26 }
 0x272   : > { %4908 = vrcp.f32 %v3353_v13  ;;  %v4899_v62 = vpop.eup %4898  ;;  %v3303_v19 = vmul.f32 %v3279_v6, %v3279_v6 }
 0x273   : > { %v3400_v34 = vmul.f32 %v4899_v62, %v3817_v23  ;;  %v4901_v0 = vpop.eup %4900  ;;  %4910 = vrcp.f32 %v3365_v16 }
 0x274   : > { %v4903_v20 = vpop.eup %4902  ;;  %v3291_v30 = vadd.f32 1.0, %v4901_v0  ;;  %v3351_v52 = vadd.f32 1.0, %v3303_v19  ;;  %v3816_v21 = vadd.f32 -1.0, %v3303_v19 }
 0x275   : > { %v3448_v9 = vmul.f32 %v3400_v34, %v5907_v60  ;;  %v4905_v10 = vpop.eup %4904  ;;  %v3412_v43 = vmul.f32 %v4903_v20, %v3829_v48 }
 0x276   : > { %v4907_v44 = vpop.eup %4906  ;;  %v3398_v18 = vmul.f32 %v4905_v10, %v3815_v56  ;;  %v3315_v5 = vmul.f32 %v3291_v30, %v3291_v30  ;;  %4912 = vrcp.f32 %v3351_v52 }
 0x277   : > { %v3472_v4 = vsel %vm3424_vm2, %v5907_v60, %v3448_v9  ;;  %v3460_v29 = vmul.f32 %v3412_v43, %v5923_v31  ;;  %v3410_v27 = vmul.f32 %v4907_v44, %v3827_v11 }
 0x278   : > { %3496 = vst [vmem:[%s5856_s6 + $0x50] sm:$0xff] %v3472_v4  ;;  %v3446_v40 = vmul.f32 %v3398_v18, %v5926_v14  ;;  %v3363_v57 = vadd.f32 1.0, %v3315_v5  ;;  %v3828_v58 = vadd.f32 -1.0, %v3315_v5 }
 0x279   : > { %v3484_v7 = vsel %vm3436_vm3, %v5923_v31, %v3460_v29  ;;  %v3458_v60 = vmul.f32 %v3410_v27, %v5929_v36 }
 0x27a   : > { %3508 = vst [vmem:[%s5856_s6 + $0xb0] sm:$0xff] %v3484_v7  ;;  %v3470_v42 = vsel %vm3422_vm4, %v5926_v14, %v3446_v40  ;;  %4914 = vrcp.f32 %v3363_v57 }
 0x27b   : > { %3494 = vst [vmem:[%s5856_s6 + $0x40] sm:$0xff] %v3470_v42  ;;  %v3482_v63 = vsel %vm3434_vm5, %v5929_v36, %v3458_v60 }
 0x27c   : > { %v4909_v33 = vpop.eup %4908  ;;  %3506 = vst [vmem:[%s5856_s6 + $0xa0] sm:$0xff] %v3482_v63 }
 0x27d   : > { %v3401_v47 = vmul.f32 %v4909_v33, %v3818_v55  ;;  %v4911_v15 = vpop.eup %4910 }
 0x27e   : > { %v3413_v39 = vmul.f32 %v4911_v15, %v3830_v61 }
 0x27f   : > { %v3449_v31 = vmul.f32 %v3401_v47, %v5941_v1 }
 0x280   : > { %v4913_v45 = vpop.eup %4912  ;;  %v3461_v36 = vmul.f32 %v3413_v39, %v5956_v8 }
 0x281   : > { %v3473_v14 = vsel %vm3425_vm6, %v5941_v1, %v3449_v31  ;;  %v3399_v35 = vmul.f32 %v4913_v45, %v3816_v21 }
 0x282   : > { %3497 = vst [vmem:[%s5856_s6 + $0x58] sm:$0xff] %v3473_v14  ;;  %v3485_v53 = vsel %vm3437_vm7, %v5956_v8, %v3461_v36 }
 0x283   : > { %3509 = vst [vmem:[%s5856_s6 + $0xb8] sm:$0xff] %v3485_v53  ;;  %v3447_v1 = vmul.f32 %v3399_v35, %v5968_v28 }
 0x284   : > { %v4915_v17 = vpop.eup %4914 }
 0x285   : > { %v3411_v51 = vmul.f32 %v4915_v17, %v3828_v58  ;;  %v3471_v49 = vsel %vm3423_vm8, %v5968_v28, %v3447_v1 }
 0x286   : > { %3495 = vst [vmem:[%s5856_s6 + $0x48] sm:$0xff] %v3471_v49 }
 0x287   : > { %v3459_v32 = vmul.f32 %v3411_v51, %v5973_v24 }
 0x289   : > { %v3483_v8 = vsel %vm3435_vm9, %v5973_v24, %v3459_v32 }
 0x28a   : > { %3507 = vst [vmem:[%s5856_s6 + $0xa8] sm:$0xff] %v3483_v8 }
 0x28b   : > { %4987 = shalt.err (!%p4984_p7)
}
 0x28c   : > { %s4988_s25 = scalar_lea.hbm %s6019_s30, 3072  ;;  %s4992_s23 = scalar_lea.hbm %s6082_s4, 12288 }
 0x28d   : > { %p4989_p1 = scmp.ne.s32.totalorder %s6019_s30, %s4988_s25  ;;  %p4993_p5 = scmp.lt.u32.totalorder %s6019_s30, %s6082_s4 }
 0x28e   : > { %p4994_p9 = scmp.lt.u32.totalorder %s4992_s23, %s4988_s25  ;;  %p4996_p6 = scmp.lt.u32.totalorder %s4988_s25, %s6019_s30 }
 0x28f   : > { %p4990_p2 = pnand %p4989_p1, %p5218_p11 }
 0x290   : > { %p4995_p0 = por %p4994_p9, %p4993_p5 }
 0x291   : > { %p4991_p4 = pneg %p4990_p2 }
 0x292   : > { %p4997_p8 = por %p4996_p6, %p4995_p0 }
 0x294   : > { %p4998_p10 = pnand %p4997_p8, %p4991_p4 }
 0x296   : > { %5001 = shalt.err (!%p4998_p10)
}
 0x297   : > { %s5083_s13 = smov 128   ;;  %s5084_s9 = smov 8  }
 0x298   : > { %4595 = dma.vmem_to_hbm [thread:$0]  (%p5218_p11), %s6021_s19, 3072, %s6019_s30, %s3511_s7, %s5083_s13, %s5083_s13, %s5084_s9  }
 0x299 PF: > { %s6113_s10 = sld [smem:[#allocation12_spill]]  ;;  %p4612_p12 = scmp.ge.s32.totalorder %s5076_s22, 2 }
 0x29a   : > { %s3542_s18 = sand.u32 1, %s5048_s15  }
 0x29b   : > { %s3543_s5 = scalar_lea.sflag [#allocation4], %s3542_s18 }
 0x29f   : > { %p6114_p13 = scmp.ne.s32.totalorder %s6113_s10, 0 }
 0x2a1   : > { %p4606_p3 = pnand %p4612_p12, %p6114_p13 }
 0x2a3   : > { %5043 = dma.done.wait (!%p4606_p3), %s3543_s5, 3072  }
 0x2a4   : > { %5045 = vsyncadd (!%p4606_p3), %s3543_s5, 4294964224  ;;  %s21_s22 = sadd.s32 1, %s5076_s22   ;;  %s6115_s18 = sld [smem:[#allocation11_spill]] }
 0x2a5   : > { %p18_p7 = scmp.ge.s32.totalorder %s21_s22, 6   ;;  %s6116_s20 = sld [smem:[#allocation13_spill]] }
 0x2a6   : > { %s6117_s11 = sld [smem:[#allocation14_spill]]  ;;  %s6118_s15 = smov %s5052_s16 }
 0x2a7   : > { %s6119_s16 = smov %s5056_s17  ;;  %s6120_s17 = smov %s5235_s26 }
 0x2a8   : > { %s6121_s19 = smov %s5072_s21  ;;  %20 = sbr.rel (!%p18_p7) target bundleno = 10 (0xa), region = 100 }
 0x2ac   : > { %s6122_s21 = smov %s6117_s11 }
 0x2af   :  { %3548 = vsyncpa [#allocation3], 1 }
 0x2b0   :  { %3550 = vsyncpa [#allocation3 + $0x1], 1 }
 0x2b1   :  { %3551 = vsyncpa [#allocation6], 1 }
 0x2b2   :  { %3552 = vsyncpa [#allocation4], 1 }
 0x2b3   :  { %3554 = vsyncpa [#allocation4 + $0x1], 1 }

</bundles_post_ra>
